<compile_context>
chip_gen: v7x
topology: tpu7x:2x2x1
jax: 0.10.0
libtpu: 0.0.40
codegen_flags: <defaults>
</compile_context>

<pallas_src>
from functools import partial

import numpy as np
import jax
import jax.numpy as jnp
from jax import lax
from jax.experimental import pallas as pl
from jax.experimental.pallas import tpu as pltpu

EMB_SIZE = 192
NUM_HEADS = 6


# ---------------------------------------------------------------------------
# One-time parameter preparation: move the qkv rearrange onto the weights.
#   original projection column index: c  = h*(D*3) + d*3 + s   (s = q/k/v, fastest)
#   new                column index: c' = s*E + h*D + d        ([Q | K | V], head-contig)
# ---------------------------------------------------------------------------
def prepare_params(params, num_heads=NUM_HEADS):
    E = params["w_qkv"].shape[0]
    D = E // num_heads
    c = np.arange(3 * E)
    s, rem = c // E, c % E
    h, d = rem // D, rem % D
    perm = h * (D * 3) + d * 3 + s            # new[:, c'] = old[:, perm[c']]
    return {
        "w_qkv": jnp.asarray(params["w_qkv"])[:, perm],
        "b_qkv": jnp.asarray(params["b_qkv"])[perm],
        "w_proj": jnp.asarray(params["w_proj"]),
        "b_proj": jnp.asarray(params["b_proj"]),
    }


# ---------------------------------------------------------------------------
# Fused kernel: one batch element per grid step.
# ---------------------------------------------------------------------------
def _mha_kernel(x_ref, wqkv_ref, bqkv_ref, wproj_ref, bproj_ref, o_ref,
                *, num_heads, inv_scale):
    x = x_ref[0]                                                   # (N, E)
    E = x.shape[-1]
    D = E // num_heads

    # QKV projection (columns already permuted to [Q | K | V], head-contiguous)
    qkv = (jnp.dot(x, wqkv_ref[...], preferred_element_type=jnp.float32)
           + bqkv_ref[...])                                        # (N, 3E)
    q = qkv[:, 0:E]
    k = qkv[:, E:2 * E]
    v = qkv[:, 2 * E:3 * E]

    # Per-head attention, statically unrolled (H = 6).  Output columns land at
    # h*D + d, i.e. exactly the 'b h n d -> b n (h d)' layout -> lane-dense (N, E).
    head_outs = []
    for h in range(num_heads):
        sl = slice(h * D, (h + 1) * D)
        qh, kh, vh = q[:, sl], k[:, sl], v[:, sl]
        # energy = qh @ kh^T without materializing the transpose
        energy = lax.dot_general(qh, kh, (((1,), (1,)), ((), ())),
                                 preferred_element_type=jnp.float32)   # (N, N)
        m = jnp.max(energy, axis=-1, keepdims=True)
        e = jnp.exp(energy - m)
        denom = jnp.sum(e, axis=-1, keepdims=True)
        # softmax THEN divide by sqrt(E) (reference semantics); scale folded into
        # the (N,1) reciprocal so the full NxN divide disappears.
        att = e * (pl.reciprocal(denom, approx=False) * inv_scale)
        # dropout == 0 -> identity
        head_outs.append(jnp.dot(att, vh, preferred_element_type=jnp.float32))

    out = jnp.concatenate(head_outs, axis=-1)                      # (N, E)

    # Output projection
    y = (jnp.dot(out, wproj_ref[...], preferred_element_type=jnp.float32)
         + bproj_ref[...])
    o_ref[0] = y


# ---------------------------------------------------------------------------
# Full forward (single pallas_call, grid over batch)
# ---------------------------------------------------------------------------
def multi_head_attention(x, prepared, num_heads=NUM_HEADS):
    # TODO(synk): mask path (mask_fill with -inf) not implemented; reference
    # default is mask=None so semantics match.
    B, N, E = x.shape
    inv_scale = 1.0 / (E ** 0.5)

    kernel = partial(_mha_kernel, num_heads=num_heads, inv_scale=inv_scale)
    return pl.pallas_call(
        kernel,
        out_shape=jax.ShapeDtypeStruct((B, N, E), jnp.float32),
        grid=(B,),
        in_specs=[
            pl.BlockSpec((1, N, E), lambda b: (b, 0, 0)),          # x (one batch)
            pl.BlockSpec((E, 3 * E), lambda b: (0, 0)),            # w_qkv (permuted)
            pl.BlockSpec((1, 3 * E), lambda b: (0, 0)),            # b_qkv (permuted)
            pl.BlockSpec((E, E), lambda b: (0, 0)),                # w_proj
            pl.BlockSpec((1, E), lambda b: (0, 0)),                # b_proj
        ],
        out_specs=pl.BlockSpec((1, N, E), lambda b: (b, 0, 0)),
        compiler_params=pltpu.CompilerParams(
            dimension_semantics=("parallel",)),
    )(x,
      prepared["w_qkv"],
      prepared["b_qkv"].reshape(1, 3 * E),
      prepared["w_proj"],
      prepared["b_proj"].reshape(1, E))


# ---------------------------------------------------------------------------
# Pure-JAX reference (uses the ORIGINAL, unpermuted params)
# ---------------------------------------------------------------------------
def reference(x, params, num_heads=NUM_HEADS):
    B, N, E = x.shape
    D = E // num_heads
    qkv = x @ params["w_qkv"] + params["b_qkv"]
    qkv = qkv.reshape(B, N, num_heads, D, 3)
    qkv = jnp.transpose(qkv, (4, 0, 2, 1, 3))
    q, k, v = qkv[0], qkv[1], qkv[2]
    energy = jnp.einsum("bhqd,bhkd->bhqk", q, k)
    att = jax.nn.softmax(energy, axis=-1) / (E ** 0.5)
    out = jnp.einsum("bhal,bhlv->bhav", att, v)
    out = jnp.transpose(out, (0, 2, 1, 3)).reshape(B, N, E)
    return out @ params["w_proj"] + params["b_proj"]


if __name__ == "__main__":
    key = jax.random.PRNGKey(0)
    k_x, k_wq, k_bq, k_wp, k_bp = jax.random.split(key, 5)

    B, N, E = 2, 8, EMB_SIZE
    x = jax.random.normal(k_x, (B, N, E), dtype=jnp.float32)

    params = {
        "w_qkv": 0.02 * jax.random.normal(k_wq, (E, 3 * E), dtype=jnp.float32),
        "b_qkv": 0.02 * jax.random.normal(k_bq, (3 * E,), dtype=jnp.float32),
        "w_proj": 0.02 * jax.random.normal(k_wp, (E, E), dtype=jnp.float32),
        "b_proj": 0.02 * jax.random.normal(k_bp, (E,), dtype=jnp.float32),
    }

    prepared = prepare_params(params)          # one-time weight permutation
    y = multi_head_attention(x, prepared)
    y = jax.block_until_ready(y)

    y_ref = reference(x, params)
    assert y.shape == (B, N, E)
    assert jnp.allclose(y, y_ref, atol=1e-4, rtol=1e-4), "mismatch vs reference"

    print("KERNEL_OK")
</pallas_src>

<mosaic_0001>
module attributes {stable_mosaic.version = 11 : i64} {
  func.func @_mha_kernel(%arg0: i32, %arg1: memref<1x8x192xf32, #tpu.memory_space<vmem>>, %arg2: memref<192x576xf32, #tpu.memory_space<vmem>>, %arg3: memref<1x576xf32, #tpu.memory_space<vmem>>, %arg4: memref<192x192xf32, #tpu.memory_space<vmem>>, %arg5: memref<1x192xf32, #tpu.memory_space<vmem>>, %arg6: memref<1x8x192xf32, #tpu.memory_space<vmem>>) attributes {dimension_semantics = [#tpu.dimension_semantics<parallel>], iteration_bounds = array<i64: 2>, scalar_prefetch = 0 : i64, scratch_operands = 0 : i64, tpu.core_type = #tpu.core_type<tc>, window_params = [{transform_indices = @transform_0, window_bounds = array<i64: 1, 8, 192>}, {pipeline_mode = #tpu.pipeline_mode<synchronous>, transform_indices = @transform_1, window_bounds = array<i64: 192, 576>}, {pipeline_mode = #tpu.pipeline_mode<synchronous>, transform_indices = @transform_2, window_bounds = array<i64: 1, 576>}, {pipeline_mode = #tpu.pipeline_mode<synchronous>, transform_indices = @transform_3, window_bounds = array<i64: 192, 192>}, {pipeline_mode = #tpu.pipeline_mode<synchronous>, transform_indices = @transform_4, window_bounds = array<i64: 1, 192>}, {transform_indices = @transform_5, window_bounds = array<i64: 1, 8, 192>}]} {
    %c0 = arith.constant 0 : index
    %c0_0 = arith.constant 0 : index
    %c0_1 = arith.constant 0 : index
    %0 = vector.load %arg1[%c0, %c0_0, %c0_1] : memref<1x8x192xf32, #tpu.memory_space<vmem>>, vector<1x8x192xf32>
    %1 = vector.shape_cast %0 : vector<1x8x192xf32> to vector<8x192xf32>
    %c0_2 = arith.constant 0 : index
    %c0_3 = arith.constant 0 : index
    %2 = vector.load %arg2[%c0_2, %c0_3] : memref<192x576xf32, #tpu.memory_space<vmem>>, vector<192x576xf32>
    %cst = arith.constant dense<0.000000e+00> : vector<8x576xf32>
    %3 = tpu.matmul %1, %2, %cst {dimension_numbers = #tpu.dot_dimension_numbers<[1], [0], [0], [1], [0, 0, 1, 1], [], []>} : vector<8x192xf32>, vector<192x576xf32>, vector<8x576xf32> -> vector<8x576xf32>
    %c0_4 = arith.constant 0 : index
    %c0_5 = arith.constant 0 : index
    %4 = vector.load %arg3[%c0_4, %c0_5] : memref<1x576xf32, #tpu.memory_space<vmem>>, vector<1x576xf32>
    %5 = vector.broadcast %4 : vector<1x576xf32> to vector<8x576xf32>
    %6 = arith.addf %3, %5 : vector<8x576xf32>
    %7 = vector.extract_strided_slice %6 {offsets = [0, 0], sizes = [8, 192], strides = [1, 1]} : vector<8x576xf32> to vector<8x192xf32>
    %8 = vector.extract_strided_slice %6 {offsets = [0, 192], sizes = [8, 192], strides = [1, 1]} : vector<8x576xf32> to vector<8x192xf32>
    %9 = vector.extract_strided_slice %6 {offsets = [0, 384], sizes = [8, 192], strides = [1, 1]} : vector<8x576xf32> to vector<8x192xf32>
    %10 = vector.extract_strided_slice %7 {offsets = [0, 0], sizes = [8, 32], strides = [1, 1]} : vector<8x192xf32> to vector<8x32xf32>
    %11 = vector.extract_strided_slice %8 {offsets = [0, 0], sizes = [8, 32], strides = [1, 1]} : vector<8x192xf32> to vector<8x32xf32>
    %12 = vector.extract_strided_slice %9 {offsets = [0, 0], sizes = [8, 32], strides = [1, 1]} : vector<8x192xf32> to vector<8x32xf32>
    %cst_6 = arith.constant dense<0.000000e+00> : vector<8x8xf32>
    %13 = tpu.matmul %10, %11, %cst_6 {dimension_numbers = #tpu.dot_dimension_numbers<[1], [1], [0], [0], [0, 0, 1, 0], [], []>} : vector<8x32xf32>, vector<8x32xf32>, vector<8x8xf32> -> vector<8x8xf32>
    %cst_7 = arith.constant dense<0xFF800000> : vector<8xf32>
    %14 = vector.multi_reduction <maximumf>, %13, %cst_7 [1] : vector<8x8xf32> to vector<8xf32>
    %15 = vector.shape_cast %14 : vector<8xf32> to vector<8x1xf32>
    %16 = vector.broadcast %15 : vector<8x1xf32> to vector<8x8xf32>
    %17 = arith.subf %13, %16 : vector<8x8xf32>
    %18 = math.exp %17 : vector<8x8xf32>
    %cst_8 = arith.constant dense<0.000000e+00> : vector<8xf32>
    %19 = vector.multi_reduction <add>, %18, %cst_8 [1] : vector<8x8xf32> to vector<8xf32>
    %20 = vector.shape_cast %19 : vector<8xf32> to vector<8x1xf32>
    %21 = tpu.reciprocal %20 : vector<8x1xf32> -> vector<8x1xf32>
    %cst_9 = arith.constant 0.0721687824 : f32
    %22 = vector.broadcast %cst_9 : f32 to vector<8x1xf32>
    %23 = arith.mulf %21, %22 : vector<8x1xf32>
    %24 = vector.broadcast %23 : vector<8x1xf32> to vector<8x8xf32>
    %25 = arith.mulf %18, %24 : vector<8x8xf32>
    %cst_10 = arith.constant dense<0.000000e+00> : vector<8x32xf32>
    %26 = tpu.matmul %25, %12, %cst_10 {dimension_numbers = #tpu.dot_dimension_numbers<[1], [0], [0], [1], [0, 0, 1, 1], [], []>} : vector<8x8xf32>, vector<8x32xf32>, vector<8x32xf32> -> vector<8x32xf32>
    %27 = vector.extract_strided_slice %7 {offsets = [0, 32], sizes = [8, 32], strides = [1, 1]} : vector<8x192xf32> to vector<8x32xf32>
    %28 = vector.extract_strided_slice %8 {offsets = [0, 32], sizes = [8, 32], strides = [1, 1]} : vector<8x192xf32> to vector<8x32xf32>
    %29 = vector.extract_strided_slice %9 {offsets = [0, 32], sizes = [8, 32], strides = [1, 1]} : vector<8x192xf32> to vector<8x32xf32>
    %cst_11 = arith.constant dense<0.000000e+00> : vector<8x8xf32>
    %30 = tpu.matmul %27, %28, %cst_11 {dimension_numbers = #tpu.dot_dimension_numbers<[1], [1], [0], [0], [0, 0, 1, 0], [], []>} : vector<8x32xf32>, vector<8x32xf32>, vector<8x8xf32> -> vector<8x8xf32>
    %cst_12 = arith.constant dense<0xFF800000> : vector<8xf32>
    %31 = vector.multi_reduction <maximumf>, %30, %cst_12 [1] : vector<8x8xf32> to vector<8xf32>
    %32 = vector.shape_cast %31 : vector<8xf32> to vector<8x1xf32>
    %33 = vector.broadcast %32 : vector<8x1xf32> to vector<8x8xf32>
    %34 = arith.subf %30, %33 : vector<8x8xf32>
    %35 = math.exp %34 : vector<8x8xf32>
    %cst_13 = arith.constant dense<0.000000e+00> : vector<8xf32>
    %36 = vector.multi_reduction <add>, %35, %cst_13 [1] : vector<8x8xf32> to vector<8xf32>
    %37 = vector.shape_cast %36 : vector<8xf32> to vector<8x1xf32>
    %38 = tpu.reciprocal %37 : vector<8x1xf32> -> vector<8x1xf32>
    %cst_14 = arith.constant 0.0721687824 : f32
    %39 = vector.broadcast %cst_14 : f32 to vector<8x1xf32>
    %40 = arith.mulf %38, %39 : vector<8x1xf32>
    %41 = vector.broadcast %40 : vector<8x1xf32> to vector<8x8xf32>
    %42 = arith.mulf %35, %41 : vector<8x8xf32>
    %cst_15 = arith.constant dense<0.000000e+00> : vector<8x32xf32>
    %43 = tpu.matmul %42, %29, %cst_15 {dimension_numbers = #tpu.dot_dimension_numbers<[1], [0], [0], [1], [0, 0, 1, 1], [], []>} : vector<8x8xf32>, vector<8x32xf32>, vector<8x32xf32> -> vector<8x32xf32>
    %44 = vector.extract_strided_slice %7 {offsets = [0, 64], sizes = [8, 32], strides = [1, 1]} : vector<8x192xf32> to vector<8x32xf32>
    %45 = vector.extract_strided_slice %8 {offsets = [0, 64], sizes = [8, 32], strides = [1, 1]} : vector<8x192xf32> to vector<8x32xf32>
    %46 = vector.extract_strided_slice %9 {offsets = [0, 64], sizes = [8, 32], strides = [1, 1]} : vector<8x192xf32> to vector<8x32xf32>
    %cst_16 = arith.constant dense<0.000000e+00> : vector<8x8xf32>
    %47 = tpu.matmul %44, %45, %cst_16 {dimension_numbers = #tpu.dot_dimension_numbers<[1], [1], [0], [0], [0, 0, 1, 0], [], []>} : vector<8x32xf32>, vector<8x32xf32>, vector<8x8xf32> -> vector<8x8xf32>
    %cst_17 = arith.constant dense<0xFF800000> : vector<8xf32>
    %48 = vector.multi_reduction <maximumf>, %47, %cst_17 [1] : vector<8x8xf32> to vector<8xf32>
    %49 = vector.shape_cast %48 : vector<8xf32> to vector<8x1xf32>
    %50 = vector.broadcast %49 : vector<8x1xf32> to vector<8x8xf32>
    %51 = arith.subf %47, %50 : vector<8x8xf32>
    %52 = math.exp %51 : vector<8x8xf32>
    %cst_18 = arith.constant dense<0.000000e+00> : vector<8xf32>
    %53 = vector.multi_reduction <add>, %52, %cst_18 [1] : vector<8x8xf32> to vector<8xf32>
    %54 = vector.shape_cast %53 : vector<8xf32> to vector<8x1xf32>
    %55 = tpu.reciprocal %54 : vector<8x1xf32> -> vector<8x1xf32>
    %cst_19 = arith.constant 0.0721687824 : f32
    %56 = vector.broadcast %cst_19 : f32 to vector<8x1xf32>
    %57 = arith.mulf %55, %56 : vector<8x1xf32>
    %58 = vector.broadcast %57 : vector<8x1xf32> to vector<8x8xf32>
    %59 = arith.mulf %52, %58 : vector<8x8xf32>
    %cst_20 = arith.constant dense<0.000000e+00> : vector<8x32xf32>
    %60 = tpu.matmul %59, %46, %cst_20 {dimension_numbers = #tpu.dot_dimension_numbers<[1], [0], [0], [1], [0, 0, 1, 1], [], []>} : vector<8x8xf32>, vector<8x32xf32>, vector<8x32xf32> -> vector<8x32xf32>
    %61 = vector.extract_strided_slice %7 {offsets = [0, 96], sizes = [8, 32], strides = [1, 1]} : vector<8x192xf32> to vector<8x32xf32>
    %62 = vector.extract_strided_slice %8 {offsets = [0, 96], sizes = [8, 32], strides = [1, 1]} : vector<8x192xf32> to vector<8x32xf32>
    %63 = vector.extract_strided_slice %9 {offsets = [0, 96], sizes = [8, 32], strides = [1, 1]} : vector<8x192xf32> to vector<8x32xf32>
    %cst_21 = arith.constant dense<0.000000e+00> : vector<8x8xf32>
    %64 = tpu.matmul %61, %62, %cst_21 {dimension_numbers = #tpu.dot_dimension_numbers<[1], [1], [0], [0], [0, 0, 1, 0], [], []>} : vector<8x32xf32>, vector<8x32xf32>, vector<8x8xf32> -> vector<8x8xf32>
    %cst_22 = arith.constant dense<0xFF800000> : vector<8xf32>
    %65 = vector.multi_reduction <maximumf>, %64, %cst_22 [1] : vector<8x8xf32> to vector<8xf32>
    %66 = vector.shape_cast %65 : vector<8xf32> to vector<8x1xf32>
    %67 = vector.broadcast %66 : vector<8x1xf32> to vector<8x8xf32>
    %68 = arith.subf %64, %67 : vector<8x8xf32>
    %69 = math.exp %68 : vector<8x8xf32>
    %cst_23 = arith.constant dense<0.000000e+00> : vector<8xf32>
    %70 = vector.multi_reduction <add>, %69, %cst_23 [1] : vector<8x8xf32> to vector<8xf32>
    %71 = vector.shape_cast %70 : vector<8xf32> to vector<8x1xf32>
    %72 = tpu.reciprocal %71 : vector<8x1xf32> -> vector<8x1xf32>
    %cst_24 = arith.constant 0.0721687824 : f32
    %73 = vector.broadcast %cst_24 : f32 to vector<8x1xf32>
    %74 = arith.mulf %72, %73 : vector<8x1xf32>
    %75 = vector.broadcast %74 : vector<8x1xf32> to vector<8x8xf32>
    %76 = arith.mulf %69, %75 : vector<8x8xf32>
    %cst_25 = arith.constant dense<0.000000e+00> : vector<8x32xf32>
    %77 = tpu.matmul %76, %63, %cst_25 {dimension_numbers = #tpu.dot_dimension_numbers<[1], [0], [0], [1], [0, 0, 1, 1], [], []>} : vector<8x8xf32>, vector<8x32xf32>, vector<8x32xf32> -> vector<8x32xf32>
    %78 = vector.extract_strided_slice %7 {offsets = [0, 128], sizes = [8, 32], strides = [1, 1]} : vector<8x192xf32> to vector<8x32xf32>
    %79 = vector.extract_strided_slice %8 {offsets = [0, 128], sizes = [8, 32], strides = [1, 1]} : vector<8x192xf32> to vector<8x32xf32>
    %80 = vector.extract_strided_slice %9 {offsets = [0, 128], sizes = [8, 32], strides = [1, 1]} : vector<8x192xf32> to vector<8x32xf32>
    %cst_26 = arith.constant dense<0.000000e+00> : vector<8x8xf32>
    %81 = tpu.matmul %78, %79, %cst_26 {dimension_numbers = #tpu.dot_dimension_numbers<[1], [1], [0], [0], [0, 0, 1, 0], [], []>} : vector<8x32xf32>, vector<8x32xf32>, vector<8x8xf32> -> vector<8x8xf32>
    %cst_27 = arith.constant dense<0xFF800000> : vector<8xf32>
    %82 = vector.multi_reduction <maximumf>, %81, %cst_27 [1] : vector<8x8xf32> to vector<8xf32>
    %83 = vector.shape_cast %82 : vector<8xf32> to vector<8x1xf32>
    %84 = vector.broadcast %83 : vector<8x1xf32> to vector<8x8xf32>
    %85 = arith.subf %81, %84 : vector<8x8xf32>
    %86 = math.exp %85 : vector<8x8xf32>
    %cst_28 = arith.constant dense<0.000000e+00> : vector<8xf32>
    %87 = vector.multi_reduction <add>, %86, %cst_28 [1] : vector<8x8xf32> to vector<8xf32>
    %88 = vector.shape_cast %87 : vector<8xf32> to vector<8x1xf32>
    %89 = tpu.reciprocal %88 : vector<8x1xf32> -> vector<8x1xf32>
    %cst_29 = arith.constant 0.0721687824 : f32
    %90 = vector.broadcast %cst_29 : f32 to vector<8x1xf32>
    %91 = arith.mulf %89, %90 : vector<8x1xf32>
    %92 = vector.broadcast %91 : vector<8x1xf32> to vector<8x8xf32>
    %93 = arith.mulf %86, %92 : vector<8x8xf32>
    %cst_30 = arith.constant dense<0.000000e+00> : vector<8x32xf32>
    %94 = tpu.matmul %93, %80, %cst_30 {dimension_numbers = #tpu.dot_dimension_numbers<[1], [0], [0], [1], [0, 0, 1, 1], [], []>} : vector<8x8xf32>, vector<8x32xf32>, vector<8x32xf32> -> vector<8x32xf32>
    %95 = vector.extract_strided_slice %7 {offsets = [0, 160], sizes = [8, 32], strides = [1, 1]} : vector<8x192xf32> to vector<8x32xf32>
    %96 = vector.extract_strided_slice %8 {offsets = [0, 160], sizes = [8, 32], strides = [1, 1]} : vector<8x192xf32> to vector<8x32xf32>
    %97 = vector.extract_strided_slice %9 {offsets = [0, 160], sizes = [8, 32], strides = [1, 1]} : vector<8x192xf32> to vector<8x32xf32>
    %cst_31 = arith.constant dense<0.000000e+00> : vector<8x8xf32>
    %98 = tpu.matmul %95, %96, %cst_31 {dimension_numbers = #tpu.dot_dimension_numbers<[1], [1], [0], [0], [0, 0, 1, 0], [], []>} : vector<8x32xf32>, vector<8x32xf32>, vector<8x8xf32> -> vector<8x8xf32>
    %cst_32 = arith.constant dense<0xFF800000> : vector<8xf32>
    %99 = vector.multi_reduction <maximumf>, %98, %cst_32 [1] : vector<8x8xf32> to vector<8xf32>
    %100 = vector.shape_cast %99 : vector<8xf32> to vector<8x1xf32>
    %101 = vector.broadcast %100 : vector<8x1xf32> to vector<8x8xf32>
    %102 = arith.subf %98, %101 : vector<8x8xf32>
    %103 = math.exp %102 : vector<8x8xf32>
    %cst_33 = arith.constant dense<0.000000e+00> : vector<8xf32>
    %104 = vector.multi_reduction <add>, %103, %cst_33 [1] : vector<8x8xf32> to vector<8xf32>
    %105 = vector.shape_cast %104 : vector<8xf32> to vector<8x1xf32>
    %106 = tpu.reciprocal %105 : vector<8x1xf32> -> vector<8x1xf32>
    %cst_34 = arith.constant 0.0721687824 : f32
    %107 = vector.broadcast %cst_34 : f32 to vector<8x1xf32>
    %108 = arith.mulf %106, %107 : vector<8x1xf32>
    %109 = vector.broadcast %108 : vector<8x1xf32> to vector<8x8xf32>
    %110 = arith.mulf %103, %109 : vector<8x8xf32>
    %cst_35 = arith.constant dense<0.000000e+00> : vector<8x32xf32>
    %111 = tpu.matmul %110, %97, %cst_35 {dimension_numbers = #tpu.dot_dimension_numbers<[1], [0], [0], [1], [0, 0, 1, 1], [], []>} : vector<8x8xf32>, vector<8x32xf32>, vector<8x32xf32> -> vector<8x32xf32>
    %112 = tpu.concatenate %26, %43, %60, %77, %94, %111 in 1 : vector<8x32xf32>, vector<8x32xf32>, vector<8x32xf32>, vector<8x32xf32>, vector<8x32xf32>, vector<8x32xf32> -> vector<8x192xf32>
    %c0_36 = arith.constant 0 : index
    %c0_37 = arith.constant 0 : index
    %113 = vector.load %arg4[%c0_36, %c0_37] : memref<192x192xf32, #tpu.memory_space<vmem>>, vector<192x192xf32>
    %cst_38 = arith.constant dense<0.000000e+00> : vector<8x192xf32>
    %114 = tpu.matmul %112, %113, %cst_38 {dimension_numbers = #tpu.dot_dimension_numbers<[1], [0], [0], [1], [0, 0, 1, 1], [], []>} : vector<8x192xf32>, vector<192x192xf32>, vector<8x192xf32> -> vector<8x192xf32>
    %c0_39 = arith.constant 0 : index
    %c0_40 = arith.constant 0 : index
    %115 = vector.load %arg5[%c0_39, %c0_40] : memref<1x192xf32, #tpu.memory_space<vmem>>, vector<1x192xf32>
    %116 = vector.broadcast %115 : vector<1x192xf32> to vector<8x192xf32>
    %117 = arith.addf %114, %116 : vector<8x192xf32>
    %c0_41 = arith.constant 0 : index
    %c0_42 = arith.constant 0 : index
    %c0_43 = arith.constant 0 : index
    %118 = vector.load %arg6[%c0_41, %c0_42, %c0_43] : memref<1x8x192xf32, #tpu.memory_space<vmem>>, vector<1x8x192xf32>
    %119 = vector.shape_cast %118 : vector<1x8x192xf32> to vector<8x192xf32>
    %120 = vector.shape_cast %117 : vector<8x192xf32> to vector<1x8x192xf32>
    tpu.vector_store %arg6[%c0_41, %c0_42, %c0_43], %120 {strides = array<i32>} : memref<1x8x192xf32, #tpu.memory_space<vmem>>, vector<1x8x192xf32>,
    return
  }
  func.func @transform_0(%arg0: i32) -> (i32, i32, i32) {
    %c0_i32 = arith.constant 0 : i32
    %c0_i32_0 = arith.constant 0 : i32
    %c0_i32_1 = arith.constant 0 : i32
    return %arg0, %c0_i32, %c0_i32_0 : i32, i32, i32
  }
  func.func @transform_1(%arg0: i32) -> (i32, i32) {
    %c0_i32 = arith.constant 0 : i32
    %c0_i32_0 = arith.constant 0 : i32
    %c0_i32_1 = arith.constant 0 : i32
    return %c0_i32, %c0_i32_0 : i32, i32
  }
  func.func @transform_2(%arg0: i32) -> (i32, i32) {
    %c0_i32 = arith.constant 0 : i32
    %c0_i32_0 = arith.constant 0 : i32
    %c0_i32_1 = arith.constant 0 : i32
    return %c0_i32, %c0_i32_0 : i32, i32
  }
  func.func @transform_3(%arg0: i32) -> (i32, i32) {
    %c0_i32 = arith.constant 0 : i32
    %c0_i32_0 = arith.constant 0 : i32
    %c0_i32_1 = arith.constant 0 : i32
    return %c0_i32, %c0_i32_0 : i32, i32
  }
  func.func @transform_4(%arg0: i32) -> (i32, i32) {
    %c0_i32 = arith.constant 0 : i32
    %c0_i32_0 = arith.constant 0 : i32
    %c0_i32_1 = arith.constant 0 : i32
    return %c0_i32, %c0_i32_0 : i32, i32
  }
  func.func @transform_5(%arg0: i32) -> (i32, i32, i32) {
    %c0_i32 = arith.constant 0 : i32
    %c0_i32_0 = arith.constant 0 : i32
    %c0_i32_1 = arith.constant 0 : i32
    return %arg0, %c0_i32, %c0_i32_0 : i32, i32, i32
  }
}

</mosaic_0001>

<bundles_post_ra>
// kernel: tpu_custom_call.1
= control target key start
LH: loop header
LB: loop body
LE: loop exit
PB: predicated region body
PF: predicated region fallthrough
CT: control target
= control target key end

     0   :  { %10 = vsyncpa [#allocation3], 0  ;;  %s2887_s0 = inlined_call_operand.hbm [shape: f32[2,8,192], index: 0, kind: input, shape index: {}]   ;;  %s2888_s1 = inlined_call_operand.hbm [shape: f32[192,576], index: 1, kind: input, shape index: {}]   ;;  %s2889_s2 = inlined_call_operand.vmem [shape: f32[1,576], index: 2, kind: input, shape index: {}]   ;;  %s2890_s3 = inlined_call_operand.hbm [shape: f32[192,192], index: 3, kind: input, shape index: {}]   ;;  %s2891_s4 = inlined_call_operand.vmem [shape: f32[1,192], index: 4, kind: input, shape index: {}]   ;;  %s2892_s5 = inlined_call_operand.hbm [shape: f32[2,8,192], index: 5, kind: output, shape index: {}]  }
   0x1   :  { %12 = vsyncpa [#allocation3 + $0x1], 0 }
   0x2   :  { %13 = vsyncpa [#allocation6], 0 }
   0x3   :  { %14 = vsyncpa [#allocation4], 0 }
   0x4   :  { %16 = vsyncpa [#allocation4 + $0x1], 0  ;;  %s2496_s18 = smov 0   ;;  %s2498_s19 = smov 0  }
   0x5   :  { %s2500_s20 = smov 0   ;;  %s2502_s21 = smov 0  }
   0x6 LB: > { %s2517_s22 = sadd.s32 4294967295, %s2450_s21   ;;  %s1887_s23 = sadd.s32 4294967294, %s2450_s21   ;;  %s2450_s21 = sphi %s2502_s21, %s2912_s21   ;;  %s2446_s20 = sphi %s2500_s20, %s2911_s20   ;;  %s2442_s19 = sphi %s2498_s19, %s2910_s19   ;;  %s2438_s18 = sphi %s2496_s18, %s2909_s18  }
   0x7   : > { %p42_p0 = scmp.ne.s32.totalorder %s2442_s19, %s2438_s18  ;;  %p2893_p1 = scmp.eq.s32.totalorder %s2517_s22, 0 }
   0x8   : > { %p156_p3 = scmp.eq.s32.totalorder %s1887_s23, 1  ;;  %p1888_p5 = scmp.ge.s32.totalorder %s2450_s21, 1 }
   0x9   : > { %p2526_p4 = por %p2893_p1, %p42_p0  ;;  %p163_p7 = scmp.lt.s32.totalorder %s2450_s21, 3 }
   0xa   : > { %p2531_p6 = por %p156_p3, %p42_p0  ;;  %s2452_s27 = smov [#allocation5]  }
   0xb   : > { %s2896_s24 = scalar_select %p2526_p4, 1, 0 }
   0xc   : > { %s2897_s25 = scalar_select %p2531_p6, 1, 0 }
   0xd   : > { %p2536_p8 = pnand %p1888_p5, %p163_p7  ;;  %s175_s28 = sshll.u32 %s2452_s27, 4  ;;  %s2540_s28 = int_to_ptr.vmem [resolvable:$true] %s175_s28 }
   0xe   : > { %s2453_s30 = smov [#allocation7]   ;;  %s2294_s9 = scalar_lea.hbm %s2888_s1, 15360 }
   0xf   : > { %p2205_p9 = pneg %p2536_p8  ;;  %s191_s6 = sshll.u32 %s2453_s30, 4  ;;  %s2551_s6 = int_to_ptr.vmem [resolvable:$true] %s191_s6 }
  0x10   : > { %p2295_p12 = scmp.ne.s32.totalorder %s2888_s1, %s2294_s9  ;;  %p2301_p5 = scmp.lt.u32.totalorder %s2294_s9, %s2888_s1 }
  0x11   : > { %p2547_p11 = pnand %p2205_p9, %p2893_p1 }
  0x13   : > { %p2296_p13 = pneg %p2547_p11 }
  0x15   : > { %p2297_p0 = pnand %p2296_p13, %p2295_p12 }
  0x17   : > { %p2298_p3 = pneg %p2297_p0 }
  0x19   : > { %p2303_p7 = pnand %p2301_p5, %p2298_p3 }
  0x1b   : > { %2306 = shalt.err (!%p2303_p7)
}
  0x1c   : > { %s2307_s14 = scalar_lea.vmem %s2540_s28, 15360  ;;  %p2315_p2 = scmp.lt.s32.totalorder %s2540_s28, %s2540_s28 }
  0x1d   : > { %p2308_p9 = scmp.ne.s32.totalorder %s2540_s28, %s2307_s14  ;;  %p2316_p12 = scmp.lt.s32.totalorder %s2307_s14, %s2307_s14 }
  0x1f   : > { %p2310_p10 = pnand %p2308_p9, %p2296_p13  ;;  %p2317_p0 = por %p2316_p12, %p2315_p2 }
  0x21   : > { %p2311_p1 = pneg %p2310_p10 }
  0x23   : > { %p2318_p6 = pnand %p2317_p0, %p2311_p1 }
  0x25   : > { %2321 = shalt.err (!%p2318_p6)
}
  0x26   : > { %s2454_s15 = smov 640   ;;  %s2455_s16 = smov 40  }
  0x27   : > { %2208 = dma.hbm_to_vmem [thread:$0]  (!%p2547_p11), %s2888_s1, 15360, %s2540_s28, [#allocation6], %s2454_s15, %s2454_s15, %s2455_s16  }
  0x28   : > { %s2322_s7 = scalar_lea.hbm %s2890_s3, 6144 }
  0x29   : > { %p2323_p2 = scmp.ne.s32.totalorder %s2890_s3, %s2322_s7  ;;  %p2329_p10 = scmp.lt.u32.totalorder %s2322_s7, %s2890_s3 }
  0x2b   : > { %p2325_p1 = pnand %p2323_p2, %p2296_p13 }
  0x2d   : > { %p2326_p6 = pneg %p2325_p1 }
  0x2f   : > { %p2331_p3 = pnand %p2329_p10, %p2326_p6 }
  0x31   : > { %2334 = shalt.err (!%p2331_p3)
}
  0x32   : > { %s2335_s28 = scalar_lea.vmem %s2551_s6, 6144  ;;  %p2343_p12 = scmp.lt.s32.totalorder %s2551_s6, %s2551_s6 }
  0x33   : > { %p2336_p5 = scmp.ne.s32.totalorder %s2551_s6, %s2335_s28  ;;  %p2344_p0 = scmp.lt.s32.totalorder %s2335_s28, %s2335_s28 }
  0x35   : > { %p2338_p7 = pnand %p2336_p5, %p2296_p13  ;;  %p2345_p2 = por %p2344_p0, %p2343_p12 }
  0x37   : > { %p2339_p9 = pneg %p2338_p7 }
  0x39   : > { %p2346_p1 = pnand %p2345_p2, %p2339_p9 }
  0x3b   : > { %2349 = shalt.err (!%p2346_p1)
}
  0x3c   : > { %s2456_s12 = smov 256   ;;  %s2457_s13 = smov 16  }
  0x3d   : > { %2211 = dma.hbm_to_vmem [thread:$0]  (!%p2547_p11), %s2890_s3, 6144, %s2551_s6, [#allocation6], %s2456_s12, %s2456_s12, %s2457_s13  }
  0x3e   : > { %s2606_s16 = sadd.s32 1, %s2450_s21   ;;  %s29_s23 = sadd.s32 1, %s2446_s20 }
  0x3f   : > { %s26_s17 = ssub.s32 %s2450_s21, %s2606_s16  ;;  %p36_p6 = scmp.ne.s32.totalorder %s2446_s20, %s2442_s19 }
  0x40   : > { %p27_p13 = scmp.eq.s32.totalorder %s26_s17, 0  ;;  %p37_p10 = scmp.eq.s32.totalorder %s2450_s21, 0 }
  0x41   : > { %p2900_p5 = scmp.eq.s32.totalorder %s2517_s22, 1  ;;  %p2222_p9 = scmp.lt.s32.totalorder %s2450_s21, 2 }
  0x42   : > { %s2615_s27 = scalar_select %p27_p13, %s2446_s20, %s29_s23  }
  0x43   : > { %p38_p3 = por %p37_p10, %p36_p6  ;;  %p2619_p7 = por %p2900_p5, %p36_p6 }
  0x44   : > { %s208_s29 = sand.u32 1, %s2446_s20   ;;  %s1927_s6 = sshll.u32 %s2450_s21, 8 }
  0x45   : > { %s2901_s30 = scalar_select %p2619_p7, 1, 0 }
  0x46   : > { %s1892_s7 = sshll.u32 %s208_s29, 4  ;;  %s2629_s10 = scalar_lea.hbm %s2887_s0, %s1927_s6 }
  0x47   : > { %s212_s11 = scalar_lea.vmem [#allocation2], %s1892_s7  ;;  %p2633_p11 = pnand %p2222_p9, %p38_p3 }
  0x48   : > { %s220_s28 = sshll.u32 %s212_s11, 4  ;;  %s209_s13 = scalar_lea.sflag [#allocation3], %s208_s29  ;;  %s2631_s28 = int_to_ptr.vmem [resolvable:$true] %s220_s28 }
  0x49   : > { %s2350_s14 = scalar_lea.hbm %s2629_s10, 256  ;;  %p2352_p0 = pneg %p2633_p11 }
  0x4a   : > { %p2351_p12 = scmp.ne.s32.totalorder %s2629_s10, %s2350_s14  ;;  %s2355_s23 = scalar_lea.hbm %s2887_s0, 512 }
  0x4b   : > { %p2356_p13 = scmp.lt.u32.totalorder %s2629_s10, %s2887_s0  ;;  %p2357_p6 = scmp.lt.u32.totalorder %s2355_s23, %s2350_s14 }
  0x4c   : > { %p2353_p2 = pnand %p2352_p0, %p2351_p12  ;;  %p2359_p3 = scmp.lt.u32.totalorder %s2350_s14, %s2629_s10 }
  0x4d   : > { %p2358_p10 = por %p2357_p6, %p2356_p13 }
  0x4e   : > { %p2354_p1 = pneg %p2353_p2 }
  0x4f   : > { %p2360_p5 = por %p2359_p3, %p2358_p10 }
  0x51   : > { %p2361_p9 = pnand %p2360_p5, %p2354_p1 }
  0x53   : > { %2364 = shalt.err (!%p2361_p9)
}
  0x54   : > { %s2365_s29 = scalar_lea.vmem %s2631_s28, 256  ;;  %s2458_s8 = smov [#allocation2]  }
  0x55   : > { %p2366_p12 = scmp.ne.s32.totalorder %s2631_s28, %s2365_s29  ;;  %s2370_s9 = sshll.u32 %s2458_s8, 4  ;;  %s2371_s9 = int_to_ptr.vmem [resolvable:$false] %s2370_s9 }
  0x56   : > { %s2372_s11 = scalar_lea.vmem %s2371_s9, 512  ;;  %p2373_p4 = scmp.lt.s32.totalorder %s2631_s28, %s2371_s9 }
  0x57   : > { %p2368_p2 = pnand %p2366_p12, %p2352_p0  ;;  %p2374_p13 = scmp.lt.s32.totalorder %s2372_s11, %s2365_s29 }
  0x59   : > { %p2369_p7 = pneg %p2368_p2  ;;  %p2375_p6 = por %p2374_p13, %p2373_p4 }
  0x5b   : > { %p2376_p10 = pnand %p2375_p6, %p2369_p7 }
  0x5d   : > { %2379 = shalt.err (!%p2376_p10)
}
  0x5e   : > { %2215 = dma.hbm_to_vmem [thread:$0]  (!%p2633_p11), %s2629_s10, 256, %s2631_s28, %s209_s13  }
  0x5f   : > { %229 = sbr.rel (%p2536_p8) target bundleno = 4236 (0x108c), region = 40  ;;  %s2665_s14 = sand.u32 (!%p2536_p8), 1, %s2442_s19  }
  0x60   : > { %s1896_s15 = sshll.u32 (!%p2536_p8), %s2665_s14, 4  ;;  %s232_s17 = scalar_lea.sflag (!%p2536_p8), [#allocation3], %s2665_s14 }
  0x61   : > { %s2671_s23 = scalar_lea.vmem (!%p2536_p8), [#allocation2], %s1896_s15  ;;  %p2903_p4 = scmp.ne.s32.totalorder (!%p2536_p8), %s2896_s24, 0 }
  0x66   : > { %2425 = dma.done.wait (%p2903_p4), %s232_s17, 256  }
  0x67   : > { %2427 = vsyncadd (%p2903_p4), %s232_s17, 4294967040  ;;  %p2904_p7 = scmp.eq.s32.totalorder %s2517_s22, 0 }
  0x69   : > { %2429 = dma.done.wait (%p2904_p7), [#allocation6], 21504   ;;  %p2905_p8 = pmov %p2904_p7 }
  0x6a   : > { %v273_v0 = vld [vmem:[#allocation5 + $0x8] sm:$0xff]  ;;  %v278_v1 = vld [vmem:[#allocation5 + $0x30] sm:$0xff]  ;;  %v272_v2 = vld [vmem:[#allocation5] sm:$0xff]  ;;  %vm419_vm0 = vcmask 523264   ;;  %vm2460_vm1 = vmmov 0   ;;  %s2461_s10 = smov 32  }
  0x6b   : > { %2431 = vsyncadd (%p2905_p8), [#allocation6], 4294945792  ;;  %v2013_v3 = vpack.c.bf16 %v278_v1, %v273_v0  ;;  %v277_v4 = vld [vmem:[#allocation5 + $0x28] sm:$0xff]  ;;  %v283_v5 = vld [vmem:[#allocation5 + $0x58] sm:$0xff]  ;;  %s2462_s28 = smov 64   ;;  %vm638_vm2 = vcmask 261120  }
  0x6c   : > { %v288_v6 = vld [vmem:[#allocation5 + $0x80] sm:$0xff]  ;;  %v2015_v7 = vpack.c.bf16 %v277_v4, %v272_v2  ;;  %v282_v9 = vld [vmem:[#allocation5 + $0x50] sm:$0xff]  ;;  %v287_v10 = vld [vmem:[#allocation5 + $0x78] sm:$0xff]  ;;  %vm714_vm3 = vcmask 64512   ;;  %s2463_s12 = smov 96   ;;  %vm1644_vm4 = vcmask 785408  }
  0x6d   : > { %v2017_v8 = vpack.c.bf16 %v288_v6, %v283_v5  ;;  %v293_v11 = vld [vmem:[#allocation5 + $0xa8] sm:$0xff]  ;;  %2014 = vmatprep.subr.bf16.mxu0 %v2013_v3  ;;  %v298_v12 = vld [vmem:[#allocation5 + $0xd0] sm:$0xff]  ;;  %v2019_v13 = vpack.c.bf16 %v287_v10, %v282_v9  ;;  %v292_v15 = vld [vmem:[#allocation5 + $0xa0] sm:$0xff]  ;;  %s1928_s6 = sshll.u32 %s2517_s22, 8  ;;  %s269_s29 = scalar_lea.vmem [#allocation8], %s1896_s15 }
  0x6e   : > { %2016 = vmatpush1.bf16.msra.mxu0 %v2015_v7  ;;  %v2021_v14 = vpack.c.bf16 %v298_v12, %v293_v11  ;;  %v297_v16 = vld [vmem:[#allocation5 + $0xc8] sm:$0xff]  ;;  %v303_v17 = vld [vmem:[#allocation5 + $0xf8] sm:$0xff]  ;;  %v308_v18 = vld [vmem:[#allocation5 + $0x120] sm:$0xff]  ;;  %s1798_s8 = sshll.u32 %s269_s29, 4  ;;  %s2842_s17 = scalar_lea.hbm %s2892_s5, %s1928_s6  ;;  %s2844_s8 = int_to_ptr.vmem [resolvable:$true] %s1798_s8 }
  0x6f   : > { %2018 = vmatprep.subr.bf16.mxu0 %v2017_v8  ;;  %v2023_v19 = vpack.c.bf16 %v297_v16, %v292_v15  ;;  %v2025_v20 = vpack.c.bf16 %v308_v18, %v303_v17  ;;  %v302_v21 = vld [vmem:[#allocation5 + $0xf0] sm:$0xff]  ;;  %v307_v22 = vld [vmem:[#allocation5 + $0x118] sm:$0xff]  ;;  %v313_v23 = vld [vmem:[#allocation5 + $0x148] sm:$0xff]  ;;  %s1784_s22 = scalar_lea.sflag [#allocation4], %s2665_s14  ;;  %s2380_s15 = scalar_lea.vmem %s2844_s8, 256 }
  0x70   : > { %v318_v24 = vld [vmem:[#allocation5 + $0x170] sm:$0xff]  ;;  %v2027_v25 = vpack.c.bf16 %v307_v22, %v302_v21  ;;  %v312_v27 = vld [vmem:[#allocation5 + $0x140] sm:$0xff]  ;;  %v317_v28 = vld [vmem:[#allocation5 + $0x168] sm:$0xff]  ;;  %p2381_p11 = scmp.ne.s32.totalorder %s2844_s8, %s2380_s15  ;;  %p2906_p0 = scmp.ne.s32.totalorder %s2901_s30, 0 }
  0x71   : > { %v2029_v26 = vpack.c.bf16 %v318_v24, %v313_v23  ;;  %v323_v29 = vld [vmem:[#allocation5 + $0x198] sm:$0xff]  ;;  %v328_v30 = vld [vmem:[#allocation5 + $0x1c0] sm:$0xff]  ;;  %v2031_v31 = vpack.c.bf16 %v317_v28, %v312_v27  ;;  %v322_v34 = vld [vmem:[#allocation5 + $0x190] sm:$0xff] }
  0x72   : > { %2020 = vmatpush1.bf16.msra.mxu0 %v2019_v13  ;;  %v271_v32 = vld [vmem:[%s2671_s23 + $0x8] sm:$0xff]  ;;  %v2033_v33 = vpack.c.bf16 %v328_v30, %v323_v29  ;;  %v338_v37 = vld [vmem:[#allocation5 + $0x210] sm:$0xff]  ;;  %v332_v40 = vld [vmem:[#allocation5 + $0x1e0] sm:$0xff]  ;;  %p2382_p1 = pnand %p2381_p11, %p2906_p0 }
  0x73   : > { %2022 = vmatprep.subr.bf16.mxu0 %v2021_v14  ;;  %v327_v35 = vld [vmem:[#allocation5 + $0x1b8] sm:$0xff]  ;;  %1900 = vmatprep.mubr.msk.f32.mxu0 %vm419_vm0, %v271_v32  ;;  %v333_v36 = vld [vmem:[#allocation5 + $0x1e8] sm:$0xff]  ;;  %v348_v43 = vld [vmem:[#allocation5 + $0x260] sm:$0xff] }
  0x74   : > { %1901 = vmatprep.mubr.msk.f32.mxu1 %vm419_vm0, %v271_v32  ;;  %v2035_v38 = vpack.c.bf16 %v327_v35, %v322_v34  ;;  %v2037_v39 = vpack.c.bf16 %v338_v37, %v333_v36  ;;  %v337_v41 = vld [vmem:[#allocation5 + $0x208] sm:$0xff]  ;;  %v343_v42 = vld [vmem:[#allocation5 + $0x238] sm:$0xff]  ;;  %v342_v46 = vld [vmem:[#allocation5 + $0x230] sm:$0xff]  ;;  %p2383_p3 = pneg %p2382_p1 }
  0x75   : > { %v2039_v44 = vpack.c.bf16 %v337_v41, %v332_v40  ;;  %v2041_v45 = vpack.c.bf16 %v348_v43, %v343_v42  ;;  %v347_v47 = vld [vmem:[#allocation5 + $0x258] sm:$0xff]  ;;  %v353_v48 = vld [vmem:[#allocation5 + $0x288] sm:$0xff]  ;;  %v358_v49 = vld [vmem:[#allocation5 + $0x2b0] sm:$0xff] }
  0x76   : > { %2024 = vmatpush1.bf16.msra.mxu0 %v2023_v19  ;;  %v2043_v50 = vpack.c.bf16 %v347_v47, %v342_v46  ;;  %v2045_v51 = vpack.c.bf16 %v358_v49, %v353_v48  ;;  %v352_v52 = vld [vmem:[#allocation5 + $0x280] sm:$0xff]  ;;  %v357_v53 = vld [vmem:[#allocation5 + $0x2a8] sm:$0xff]  ;;  %v363_v54 = vld [vmem:[#allocation5 + $0x2d8] sm:$0xff] }
  0x77   : > { %2026 = vmatprep.subr.bf16.mxu0 %v2025_v20  ;;  %v368_v55 = vld [vmem:[#allocation5 + $0x300] sm:$0xff]  ;;  %v2047_v56 = vpack.c.bf16 %v357_v53, %v352_v52  ;;  %v362_v58 = vld [vmem:[#allocation5 + $0x2d0] sm:$0xff]  ;;  %v367_v59 = vld [vmem:[#allocation5 + $0x2f8] sm:$0xff] }
  0x78   : > { %v2049_v57 = vpack.c.bf16 %v368_v55, %v363_v54  ;;  %v373_v60 = vld [vmem:[#allocation5 + $0x328] sm:$0xff]  ;;  %v378_v61 = vld [vmem:[#allocation5 + $0x350] sm:$0xff]  ;;  %v2051_v62 = vpack.c.bf16 %v367_v59, %v362_v58  ;;  %v372_v0 = vld [vmem:[#allocation5 + $0x320] sm:$0xff] }
  0x79   : > { %v2053_v63 = vpack.c.bf16 %v378_v61, %v373_v60  ;;  %v377_v1 = vld [vmem:[#allocation5 + $0x348] sm:$0xff]  ;;  %v383_v2 = vld [vmem:[#allocation5 + $0x378] sm:$0xff]  ;;  %v388_v3 = vld [vmem:[#allocation5 + $0x3a0] sm:$0xff] }
  0x7a   : > { %2028 = vmatpush1.bf16.msra.mxu0 %v2027_v25  ;;  %v2055_v4 = vpack.c.bf16 %v377_v1, %v372_v0  ;;  %v2057_v5 = vpack.c.bf16 %v388_v3, %v383_v2  ;;  %v382_v6 = vld [vmem:[#allocation5 + $0x370] sm:$0xff]  ;;  %v387_v7 = vld [vmem:[#allocation5 + $0x398] sm:$0xff]  ;;  %v280_v11 = vld [vmem:[#allocation5 + $0x40] sm:$0xff] }
  0x7b   : > { %2030 = vmatprep.subr.bf16.mxu0 %v2029_v26  ;;  %v2059_v8 = vpack.c.bf16 %v387_v7, %v382_v6  ;;  %v2685_v9 = vld [vmem:[%s2671_s23] sm:$0xff]  ;;  %v275_v10 = vld [vmem:[#allocation5 + $0x18] sm:$0xff]  ;;  %v285_v15 = vld [vmem:[#allocation5 + $0x68] sm:$0xff]  ;;  %s2465_s23 = smov [#allocation8]  }
  0x7c   : > { %v274_v12 = vld [vmem:[#allocation5 + $0x10] sm:$0xff]  ;;  %v2061_v13 = vpack.c.bf16 %v280_v11, %v275_v10  ;;  %v279_v14 = vld [vmem:[#allocation5 + $0x38] sm:$0xff]  ;;  %v284_v19 = vld [vmem:[#allocation5 + $0x60] sm:$0xff]  ;;  %s2384_s24 = sshll.u32 %s2465_s23, 4  ;;  %s2385_s24 = int_to_ptr.vmem [resolvable:$false] %s2384_s24 }
  0x7d   : > { %v290_v16 = vld [vmem:[#allocation5 + $0x90] sm:$0xff]  ;;  %v2063_v17 = vpack.c.bf16 %v279_v14, %v274_v12  ;;  %v289_v20 = vld [vmem:[#allocation5 + $0x88] sm:$0xff]  ;;  %v295_v21 = vld [vmem:[#allocation5 + $0xb8] sm:$0xff]  ;;  %s2386_s26 = scalar_lea.vmem %s2385_s24, 512  ;;  %p2387_p5 = scmp.lt.s32.totalorder %s2844_s8, %s2385_s24 }
  0x7e   : > { %2032 = vmatpush1.bf16.msra.mxu0 %v2031_v31  ;;  %v2065_v18 = vpack.c.bf16 %v290_v16, %v285_v15  ;;  %2062 = vmatprep.subr.bf16.mxu1 %v2061_v13  ;;  %v300_v22 = vld [vmem:[#allocation5 + $0xe0] sm:$0xff]  ;;  %v2067_v23 = vpack.c.bf16 %v289_v20, %v284_v19  ;;  %v294_v25 = vld [vmem:[#allocation5 + $0xb0] sm:$0xff]  ;;  %v299_v26 = vld [vmem:[#allocation5 + $0xd8] sm:$0xff]  ;;  %v2459_v19 = vmov 0.0   ;;  %v394_v20 = vlaneseq  ;;  %p2388_p9 = scmp.lt.s32.totalorder %s2386_s26, %s2380_s15 }
  0x7f   : > { %2034 = vmatprep.subr.bf16.mxu0 %v2033_v33  ;;  %2064 = vmatpush1.bf16.msra.mxu1 %v2063_v17  ;;  %v2069_v24 = vpack.c.bf16 %v300_v22, %v295_v21  ;;  %v305_v27 = vld [vmem:[#allocation5 + $0x108] sm:$0xff]  ;;  %v310_v28 = vld [vmem:[#allocation5 + $0x130] sm:$0xff]  ;;  %v2071_v29 = vpack.c.bf16 %v299_v26, %v294_v25  ;;  %v304_v31 = vld [vmem:[#allocation5 + $0x100] sm:$0xff] }
  0x80   : > { %2066 = vmatprep.subr.bf16.mxu1 %v2065_v18  ;;  %v2073_v30 = vpack.c.bf16 %v310_v28, %v305_v27  ;;  %v315_v33 = vld [vmem:[#allocation5 + $0x158] sm:$0xff]  ;;  %v320_v34 = vld [vmem:[#allocation5 + $0x180] sm:$0xff]  ;;  %v314_v37 = vld [vmem:[#allocation5 + $0x150] sm:$0xff]  ;;  %v2691_v21 = vshrl.u32 %v394_v20, 7  ;;  %p2389_p12 = por %p2388_p9, %p2387_p5 }
  0x81   : > { %v2077_v36 = vpack.c.bf16 %v320_v34, %v315_v33  ;;  %v330_v40 = vld [vmem:[#allocation5 + $0x1d0] sm:$0xff]  ;;  %v324_v43 = vld [vmem:[#allocation5 + $0x1a0] sm:$0xff]  ;;  %v379_v11 = vld [vmem:[#allocation5 + $0x358] sm:$0xff] }
  0x82   : > { %2036 = vmatpush1.bf16.msra.mxu0 %v2035_v38  ;;  %v319_v38 = vld [vmem:[#allocation5 + $0x178] sm:$0xff]  ;;  %v340_v46 = vld [vmem:[#allocation5 + $0x220] sm:$0xff]  ;;  %v334_v49 = vld [vmem:[#allocation5 + $0x1f0] sm:$0xff]  ;;  %v400_v22 = vsub.s32 1, %v2691_v21  ;;  %v396_v28 = vsub.s32 0, %v2691_v21  ;;  %p2390_p2 = pnand %p2389_p12, %p2383_p3 }
  0x83   : > { %2038 = vmatprep.subr.bf16.mxu0 %v2037_v39  ;;  %2068 = vmatpush1.bf16.msra.mxu1 %v2067_v23  ;;  %v325_v39 = vld [vmem:[#allocation5 + $0x1a8] sm:$0xff]  ;;  %v2079_v41 = vpack.c.bf16 %v319_v38, %v314_v37  ;;  %v350_v52 = vld [vmem:[#allocation5 + $0x270] sm:$0xff]  ;;  %v344_v55 = vld [vmem:[#allocation5 + $0x240] sm:$0xff] }
  0x84   : > { %2070 = vmatprep.subr.bf16.mxu1 %v2069_v24  ;;  %v2081_v42 = vpack.c.bf16 %v330_v40, %v325_v39  ;;  %v360_v58 = vld [vmem:[#allocation5 + $0x2c0] sm:$0xff]  ;;  %v354_v61 = vld [vmem:[#allocation5 + $0x290] sm:$0xff]  ;;  %v385_v12 = vld [vmem:[#allocation5 + $0x388] sm:$0xff] }
  0x85   : > { %v370_v0 = vld [vmem:[#allocation5 + $0x310] sm:$0xff]  ;;  %v364_v3 = vld [vmem:[#allocation5 + $0x2e0] sm:$0xff]  ;;  %v389_v17 = vld [vmem:[#allocation5 + $0x3a8] sm:$0xff] }
  0x86   : > { %2040 = vmatpush1.bf16.msra.mxu0 %v2039_v44  ;;  %v329_v44 = vld [vmem:[#allocation5 + $0x1c8] sm:$0xff]  ;;  %v380_v6 = vld [vmem:[#allocation5 + $0x360] sm:$0xff]  ;;  %v374_v10 = vld [vmem:[#allocation5 + $0x330] sm:$0xff] }
  0x87   : > { %2042 = vmatprep.subr.bf16.mxu0 %v2041_v45  ;;  %2072 = vmatpush1.bf16.msra.mxu1 %v2071_v29  ;;  %v335_v45 = vld [vmem:[#allocation5 + $0x1f8] sm:$0xff]  ;;  %v2083_v47 = vpack.c.bf16 %v329_v44, %v324_v43  ;;  %v390_v13 = vld [vmem:[#allocation5 + $0x3b0] sm:$0xff]  ;;  %v2103_v14 = vpack.c.bf16 %v379_v11, %v374_v10  ;;  %v384_v16 = vld [vmem:[#allocation5 + $0x380] sm:$0xff] }
  0x88   : > { %2074 = vmatprep.subr.bf16.mxu1 %v2073_v30  ;;  %v2085_v48 = vpack.c.bf16 %v340_v46, %v335_v45  ;;  %v2105_v15 = vpack.c.bf16 %v390_v13, %v385_v12  ;;  %v2107_v18 = vpack.c.bf16 %v389_v17, %v384_v16  ;;  %v2699_v23 = vld [vmem:[%s2889_s2] sm:$0x1f] }
  0x89   : > { %v401_v24 = vrot.slane %v2699_v23, %v400_v22  ;;  %v397_v29 = vrot.slane %v2699_v23, %v396_v28 }
  0x8a   : > { %2044 = vmatpush1.bf16.msra.mxu0 %v2043_v50  ;;  %v339_v50 = vld [vmem:[#allocation5 + $0x218] sm:$0xff] }
  0x8b   : > { %2046 = vmatprep.subr.bf16.mxu0 %v2045_v51  ;;  %v345_v51 = vld [vmem:[#allocation5 + $0x248] sm:$0xff]  ;;  %v2087_v53 = vpack.c.bf16 %v339_v50, %v334_v49 }
  0x8c   : > { %v2089_v54 = vpack.c.bf16 %v350_v52, %v345_v51 }
  0x8e   : > { %2048 = vmatpush1.bf16.msra.mxu0 %v2047_v56  ;;  %v349_v56 = vld [vmem:[#allocation5 + $0x268] sm:$0xff] }
  0x8f   : > { %2050 = vmatprep.subr.bf16.mxu0 %v2049_v57  ;;  %v355_v57 = vld [vmem:[#allocation5 + $0x298] sm:$0xff]  ;;  %v2091_v59 = vpack.c.bf16 %v349_v56, %v344_v55 }
  0x90   : > { %v2093_v60 = vpack.c.bf16 %v360_v58, %v355_v57 }
  0x92   : > { %2052 = vmatpush1.bf16.msra.mxu0 %v2051_v62  ;;  %v359_v62 = vld [vmem:[#allocation5 + $0x2b8] sm:$0xff] }
  0x93   : > { %2054 = vmatprep.subr.bf16.mxu0 %v2053_v63  ;;  %v365_v63 = vld [vmem:[#allocation5 + $0x2e8] sm:$0xff]  ;;  %v2095_v1 = vpack.c.bf16 %v359_v62, %v354_v61 }
  0x94   : > { %v2097_v2 = vpack.c.bf16 %v370_v0, %v365_v63  ;;  %v404_v63 = vsub.s32 2, %v2691_v21 }
  0x96   : > { %2056 = vmatpush1.bf16.msra.mxu0 %v2055_v4  ;;  %v369_v4 = vld [vmem:[#allocation5 + $0x308] sm:$0xff] }
  0x97   : > { %2058 = vmatprep.subr.bf16.mxu0 %v2057_v5  ;;  %v375_v5 = vld [vmem:[#allocation5 + $0x338] sm:$0xff]  ;;  %v2099_v7 = vpack.c.bf16 %v369_v4, %v364_v3 }
  0x9a   : > { %2060 = vmatpush1.bf16.msra.mxu0 %v2059_v8  ;;  %v2101_v8 = vpack.c.bf16 %v380_v6, %v375_v5 }
  0x9d   : > { %488 = vmatmul.mubr.f32.vlgmr.msra.gmra.mrb[0].mxu0 %v2685_v9 }
  0x9e   : > { %1902 = vmatprep.mubr.msk.f32.mxu0 %vm419_vm0, %v271_v32  ;;  %v309_v32 = vld [vmem:[#allocation5 + $0x128] sm:$0xff] }
  0x9f   : > { %v2075_v35 = vpack.c.bf16 %v309_v32, %v304_v31  ;;  %v408_v32 = vsub.s32 3, %v2691_v21 }
  0xa1   : > { %2076 = vmatpush1.bf16.msra.mxu1 %v2075_v35  ;;  %v409_v33 = vrot.slane %v2699_v23, %v408_v32 }
  0xa2   : > { %2078 = vmatprep.subr.bf16.mxu1 %v2077_v36 }
  0xa5   : > { %2080 = vmatpush1.bf16.msra.mxu1 %v2079_v41 }
  0xa6   : > { %2082 = vmatprep.subr.bf16.mxu1 %v2081_v42 }
  0xa9   : > { %2084 = vmatpush1.bf16.msra.mxu1 %v2083_v47 }
  0xaa   : > { %2086 = vmatprep.subr.bf16.mxu1 %v2085_v48 }
  0xad   : > { %2088 = vmatpush1.bf16.msra.mxu1 %v2087_v53 }
  0xae   : > { %2090 = vmatprep.subr.bf16.mxu1 %v2089_v54 }
  0xb1   : > { %2092 = vmatpush1.bf16.msra.mxu1 %v2091_v59 }
  0xb2   : > { %2094 = vmatprep.subr.bf16.mxu1 %v2093_v60 }
  0xb5   : > { %2096 = vmatpush1.bf16.msra.mxu1 %v2095_v1  ;;  %v405_v1 = vrot.slane %v2699_v23, %v404_v63  ;;  %v326_v63 = vld [vmem:[#allocation5 + $0x1b0] sm:$0xff] }
  0xb6   : > { %2098 = vmatprep.subr.bf16.mxu1 %v2097_v2 }
  0xb9   : > { %2100 = vmatpush1.bf16.msra.mxu1 %v2099_v7 }
  0xba   : > { %2102 = vmatprep.subr.bf16.mxu1 %v2101_v8 }
  0xbd   : > { %2104 = vmatpush1.bf16.msra.mxu1 %v2103_v14 }
  0xbe   : > { %2106 = vmatprep.subr.bf16.mxu1 %v2105_v15 }
  0xc1   : > { %2108 = vmatpush1.bf16.msra.mxu1 %v2107_v18 }
  0xc2   : > { %1953 = vmatprep.subr.mxu1 %v2459_v19 }
  0xc4   : > { %559 = vmatmul.mubr.f32.vlgmr.msra.gmra.mrb[0].mxu1 %v2685_v9 }
  0xc5   : > { %1955 = vmatprep.mubr.msk.f32.mxu1 %vm2460_vm1, %v2459_v19 }
 0x170   : > { %v489_v25 = vpop.f32.mrb[0].mxu0 }
 0x171   : > { %v491_v26 = vpop.f32.mrb[1].mxu0  ;;  %v2715_v31 = vadd.f32 %v489_v25, %v397_v29 }
 0x172   : > { %v2704_v27 = vadd.f32 %v491_v26, %v401_v24 }
 0x174   : > { %802 = vrot.lane.b32.xlu1 %v2704_v27, %s2461_s10  ;;  %636 = vrot.lane.b32.xlu0 %v2704_v27, %s2462_s28 }
 0x197   : > { %v560_v34 = vpop.f32.mrb[0].mxu1 }
 0x198   : > { %v562_v35 = vpop.f32.mrb[1].mxu1  ;;  %v561_v4 = vadd.f32 %v560_v34, %v405_v1 }
 0x199   : > { %v2724_v36 = vadd.f32 %v562_v35, %v409_v33 }
 0x1e6   : > { %v637_v30 = vpop.permute.xlu0 %636  ;;  %v803_v45 = vpop.permute.xlu1 %802 }
 0x1e7   : > { %1954 = vmatpush3.xpose.msk.msra.mxu1 %vm638_vm2, %v637_v30 }
 0x1e8   : > { %1958 = vmatprep.subr.mxu1 %v2459_v19 }
 0x1ea   : > { %1956 = vmatmul.mubr.msk.f32.vlgmr.msra.gmra.mrb[2].mxu1 %vm638_vm2, %v2715_v31 }
 0x1eb   : > { %1960 = vmatprep.mubr.msk.f32.mxu1 %vm2460_vm1, %v2459_v19  ;;  %1959 = vmatpush3.msra.mxu1 %v2724_v36 }
 0x1ec   : > { %1963 = vmatprep.subr.mxu1 %v2459_v19 }
 0x2bd   : > { %v710_v37 = vpop.f32.mrb[2].mxu1 }
 0x2be   : > { %v1957_v38 = vpop.f32.mrb[3].mxu1  ;;  %v715_v39 = vsel %vm714_vm3, %v710_v37, -inf }
 0x2bf   : > { %716 = vmax.xlane.f32.xlu0 %v715_v39 }
 0x34c   : > { %v717_v40 = vpop.xlane.xlu0 %716 }
 0x34d   : > { %v718_v41 = vsub.f32 %v710_v37, %v717_v40 }
 0x34f   : > { %v719_v42 = vmul.f32 1.442695, %v718_v41 }
 0x351   : > { %2270 = vpow2.f32 %v719_v42 }
 0x35b   : > { %v2271_v43 = vpop.eup %2270 }
 0x35c   : > { %v721_v44 = vsel %vm714_vm3, %v2271_v43, 0.0 }
 0x35d   : > { %722 = vadd.xlane.f32.xlu1 %v721_v44 }
 0x36e   : > { %800 = vrot.lane.b32.xlu1 %v2715_v31, %s2463_s12 }
 0x3ea   : > { %v723_v46 = vpop.xlane.xlu1 %722 }
 0x3eb   : > { %2272 = vrcp.f32 %v723_v46  ;;  %v276_v46 = vld [vmem:[#allocation5 + $0x20] sm:$0xff] }
 0x3ee   : > { %v801_v50 = vpop.permute.xlu1 %800 }
 0x3f5   : > { %v2273_v47 = vpop.eup %2272 }
 0x3f6   : > { %v725_v48 = vmul.f32 0.07216878, %v2273_v47  ;;  %v281_v47 = vld [vmem:[#allocation5 + $0x48] sm:$0xff] }
 0x3f8   : > { %v726_v49 = vmul.f32 %v2271_v43, %v725_v48  ;;  %v286_v48 = vld [vmem:[#allocation5 + $0x70] sm:$0xff] }
 0x3fa   : > { %1961 = vmatmul.mubr.msk.f32.vlgmr.msra.gmra.mrb[4].mxu1 %vm714_vm3, %v726_v49  ;;  %v2464_v49 = vmov 0.0|0.0  }
 0x3fb   : > { %1964 = vmatpush3.xpose.msk.msra.mxu1 %vm638_vm2, %v803_v45  ;;  %1965 = vmatprep.mubr.msk.f32.mxu1 %vm2460_vm1, %v2459_v19 }
 0x3fc   : > { %1968 = vmatprep.subr.mxu1 %v2459_v19  ;;  %2109 = vmatprep.subr.bf16.mxu0 %v2464_v49 }
 0x3fe   : > { %1966 = vmatmul.mubr.msk.f32.vlgmr.msra.gmra.mrb[6].mxu1 %vm638_vm2, %v801_v50  ;;  %v2110_v50 = vpack.c.bf16 %v281_v47, %v276_v46 }
 0x3ff   : > { %1970 = vmatprep.mubr.msk.f32.mxu1 %vm2460_vm1, %v2459_v19 }
 0x400   : > { %2111 = vmatpush1.bf16.msra.mxu0 %v2110_v50 }
 0x401   : > { %2112 = vmatprep.subr.bf16.mxu0 %v2464_v49 }
 0x4cd   : > { %v2740_v51 = vpop.f32.mrb[4].mxu1 }
 0x4ce   : > { %v1962_v52 = vpop.f32.mrb[5].mxu1 }
 0x4cf   : > { %v291_v52 = vld [vmem:[#allocation5 + $0x98] sm:$0xff] }
 0x4d1   : > { %v874_v53 = vpop.f32.mrb[6].mxu1 }
 0x4d2   : > { %v1967_v54 = vpop.f32.mrb[7].mxu1  ;;  %v878_v55 = vsel %vm714_vm3, %v874_v53, -inf }
 0x4d3   : > { %879 = vmax.xlane.f32.xlu1 %v878_v55  ;;  %v296_v54 = vld [vmem:[#allocation5 + $0xc0] sm:$0xff]  ;;  %v301_v55 = vld [vmem:[#allocation5 + $0xe8] sm:$0xff] }
 0x560   : > { %v880_v56 = vpop.xlane.xlu1 %879 }
 0x561   : > { %v881_v57 = vsub.f32 %v874_v53, %v880_v56  ;;  %v2113_v53 = vpack.c.bf16 %v291_v52, %v286_v48  ;;  %v2116_v56 = vpack.c.bf16 %v301_v55, %v296_v54 }
 0x563   : > { %v882_v58 = vmul.f32 1.442695, %v881_v57  ;;  %2114 = vmatpush1.bf16.msra.mxu0 %v2113_v53  ;;  %v306_v57 = vld [vmem:[#allocation5 + $0x110] sm:$0xff] }
 0x564   : > { %2115 = vmatprep.subr.bf16.mxu0 %v2464_v49 }
 0x565   : > { %2274 = vpow2.f32 %v882_v58  ;;  %v311_v58 = vld [vmem:[#allocation5 + $0x138] sm:$0xff] }
 0x567   : > { %2117 = vmatpush1.bf16.msra.mxu0 %v2116_v56 }
 0x568   : > { %2118 = vmatprep.subr.bf16.mxu0 %v2464_v49 }
 0x56f   : > { %v2275_v59 = vpop.eup %2274 }
 0x570   : > { %v884_v60 = vsel %vm714_vm3, %v2275_v59, 0.0 }
 0x571   : > { %885 = vadd.xlane.f32.xlu0 %v884_v60  ;;  %v316_v60 = vld [vmem:[#allocation5 + $0x160] sm:$0xff] }
 0x587   : > { %891 = vrot.lane.b32.xlu0 %v2724_v36, %s2463_s12 }
 0x58b   : > { %967 = vrot.lane.b32.xlu0 %v2715_v31, %s2462_s28 }
 0x5fe   : > { %v886_v61 = vpop.xlane.xlu0 %885 }
 0x5ff   : > { %2276 = vrcp.f32 %v886_v61  ;;  %v321_v61 = vld [vmem:[#allocation5 + $0x188] sm:$0xff] }
 0x602   : > { %v892_v62 = vpop.permute.xlu0 %891 }
 0x603   : > { %1969 = vmatpush3.msra.mxu1 %v892_v62  ;;  %v2122_v62 = vpack.c.bf16 %v321_v61, %v316_v60 }
 0x604   : > { %1973 = vmatprep.subr.mxu1 %v2459_v19 }
 0x606   : > { %v968_v5 = vpop.permute.xlu0 %967 }
 0x609   : > { %v2277_v0 = vpop.eup %2276 }
 0x60a   : > { %v888_v2 = vmul.f32 0.07216878, %v2277_v0  ;;  %v331_v0 = vld [vmem:[#allocation5 + $0x1d8] sm:$0xff] }
 0x60b   : > { %v2125_v1 = vpack.c.bf16 %v331_v0, %v326_v63  ;;  %v1650_v63 = vld [vmem:[#allocation7 + $0x18] sm:$0xff]  ;;  %v1647_v0 = vld [vmem:[#allocation7] sm:$0xff] }
 0x60c   : > { %v889_v3 = vmul.f32 %v2275_v59, %v888_v2  ;;  %v2119_v59 = vpack.c.bf16 %v311_v58, %v306_v57  ;;  %v336_v2 = vld [vmem:[#allocation5 + $0x200] sm:$0xff] }
 0x60e   : > { %1971 = vmatmul.mubr.msk.f32.vlgmr.msra.gmra.mrb[8].mxu1 %vm714_vm3, %v889_v3  ;;  %2120 = vmatpush1.bf16.msra.mxu0 %v2119_v59  ;;  %v341_v3 = vld [vmem:[#allocation5 + $0x228] sm:$0xff] }
 0x60f   : > { %1974 = vmatpush3.xpose.msk.msra.mxu1 %vm638_vm2, %v561_v4  ;;  %1975 = vmatprep.mubr.msk.f32.mxu1 %vm2460_vm1, %v2459_v19 }
 0x610   : > { %1978 = vmatprep.subr.mxu1 %v2459_v19  ;;  %2121 = vmatprep.subr.bf16.mxu0 %v2464_v49 }
 0x612   : > { %1976 = vmatmul.mubr.msk.f32.vlgmr.msra.gmra.mrb[10].mxu1 %vm638_vm2, %v968_v5  ;;  %2123 = vmatpush1.bf16.msra.mxu0 %v2122_v62  ;;  %v346_v5 = vld [vmem:[#allocation5 + $0x250] sm:$0xff]  ;;  %v1648_v62 = vld [vmem:[#allocation7 + $0x8] sm:$0xff] }
 0x613   : > { %1980 = vmatprep.mubr.msk.f32.mxu1 %vm2460_vm1, %v2459_v19  ;;  %2124 = vmatprep.subr.bf16.mxu0 %v2464_v49 }
 0x616   : > { %2126 = vmatpush1.bf16.msra.mxu0 %v2125_v1  ;;  %v2145_v1 = vpack.c.bf16 %v1650_v63, %v1648_v62  ;;  %v1688_v62 = vld [vmem:[#allocation7 + $0x148] sm:$0xff]  ;;  %v1690_v63 = vld [vmem:[#allocation7 + $0x158] sm:$0xff] }
 0x617   : > { %2127 = vmatprep.subr.bf16.mxu0 %v2464_v49 }
 0x6e1   : > { %v2759_v6 = vpop.f32.mrb[8].mxu1 }
 0x6e2   : > { %v1972_v7 = vpop.f32.mrb[9].mxu1 }
 0x6e3   : > { %v351_v7 = vld [vmem:[#allocation5 + $0x278] sm:$0xff] }
 0x6e5   : > { %v1040_v8 = vpop.f32.mrb[10].mxu1 }
 0x6e6   : > { %v1977_v10 = vpop.f32.mrb[11].mxu1  ;;  %v1044_v11 = vsel %vm714_vm3, %v1040_v8, -inf }
 0x6e7   : > { %1045 = vmax.xlane.f32.xlu1 %v1044_v11  ;;  %v356_v10 = vld [vmem:[#allocation5 + $0x2a0] sm:$0xff]  ;;  %v361_v11 = vld [vmem:[#allocation5 + $0x2c8] sm:$0xff] }
 0x6f8   : > { %1056 = vrot.lane.b32.xlu1 %v2724_v36, %s2462_s28 }
 0x6fc   : > { %1134 = vrot.lane.b32.xlu1 %v561_v4, %s2463_s12 }
 0x700   : > { %1132 = vrot.lane.b32.xlu1 %v2715_v31, %s2461_s10 }
 0x774   : > { %v1046_v12 = vpop.xlane.xlu1 %1045 }
 0x775   : > { %v1047_v13 = vsub.f32 %v1040_v8, %v1046_v12  ;;  %v2131_v8 = vpack.c.bf16 %v351_v7, %v346_v5  ;;  %v2134_v12 = vpack.c.bf16 %v361_v11, %v356_v10  ;;  %v1651_v5 = vld [vmem:[#allocation7 + $0x20] sm:$0xff]  ;;  %v1653_v7 = vld [vmem:[#allocation7 + $0x30] sm:$0xff]  ;;  %v1658_v10 = vld [vmem:[#allocation7 + $0x58] sm:$0xff] }
 0x776   : > { %v2151_v11 = vpack.c.bf16 %v1653_v7, %v1651_v5  ;;  %v1691_v7 = vld [vmem:[#allocation7 + $0x160] sm:$0xff] }
 0x777   : > { %v1048_v14 = vmul.f32 1.442695, %v1047_v13  ;;  %v366_v13 = vld [vmem:[#allocation5 + $0x2f0] sm:$0xff] }
 0x778   : > { %v1057_v15 = vpop.permute.xlu1 %1056 }
 0x779   : > { %2278 = vpow2.f32 %v1048_v14  ;;  %1979 = vmatpush3.msra.mxu1 %v1057_v15  ;;  %v371_v14 = vld [vmem:[#allocation5 + $0x318] sm:$0xff] }
 0x77a   : > { %1983 = vmatprep.subr.mxu1 %v2459_v19  ;;  %v2137_v15 = vpack.c.bf16 %v371_v14, %v366_v13  ;;  %v1655_v13 = vld [vmem:[#allocation7 + $0x40] sm:$0xff]  ;;  %v1657_v14 = vld [vmem:[#allocation7 + $0x50] sm:$0xff] }
 0x77c   : > { %v1135_v25 = vpop.permute.xlu1 %1134 }
 0x780   : > { %v1133_v29 = vpop.permute.xlu1 %1132 }
 0x783   : > { %v2279_v16 = vpop.eup %2278 }
 0x784   : > { %v1050_v17 = vsel %vm714_vm3, %v2279_v16, 0.0 }
 0x785   : > { %1051 = vadd.xlane.f32.xlu0 %v1050_v17  ;;  %v381_v17 = vld [vmem:[#allocation5 + $0x368] sm:$0xff] }
 0x79b   : > { %1222 = vrot.lane.b32.xlu0 %v2724_v36, %s2461_s10 }
 0x812   : > { %v1052_v18 = vpop.xlane.xlu0 %1051 }
 0x813   : > { %2280 = vrcp.f32 %v1052_v18 }
 0x816   : > { %v1223_v30 = vpop.permute.xlu0 %1222 }
 0x81d   : > { %v2281_v20 = vpop.eup %2280 }
 0x81e   : > { %v1054_v24 = vmul.f32 0.07216878, %v2281_v20  ;;  %v386_v20 = vld [vmem:[#allocation5 + $0x390] sm:$0xff] }
 0x820   : > { %v1055_v26 = vmul.f32 %v2279_v16, %v1054_v24  ;;  %v376_v16 = vld [vmem:[#allocation5 + $0x340] sm:$0xff]  ;;  %v391_v24 = vld [vmem:[#allocation5 + $0x3b8] sm:$0xff] }
 0x821   : > { %v2140_v18 = vpack.c.bf16 %v381_v17, %v376_v16  ;;  %v1662_v16 = vld [vmem:[#allocation7 + $0x78] sm:$0xff]  ;;  %v2155_v17 = vpack.c.bf16 %v1657_v14, %v1655_v13 }
 0x822   : > { %1981 = vmatmul.mubr.msk.f32.vlgmr.msra.gmra.mrb[12].mxu1 %vm714_vm3, %v1055_v26 }
 0x823   : > { %1984 = vmatpush3.xpose.msk.msra.mxu1 %vm638_vm2, %v1135_v25  ;;  %1985 = vmatprep.mubr.msk.f32.mxu1 %vm2460_vm1, %v2459_v19  ;;  %v2143_v25 = vpack.c.bf16 %v391_v24, %v386_v20  ;;  %v1659_v20 = vld [vmem:[#allocation7 + $0x60] sm:$0xff]  ;;  %v1661_v24 = vld [vmem:[#allocation7 + $0x70] sm:$0xff] }
 0x824   : > { %1988 = vmatprep.subr.mxu1 %v2459_v19 }
 0x826   : > { %1986 = vmatmul.mubr.msk.f32.vlgmr.msra.gmra.mrb[14].mxu1 %vm638_vm2, %v1133_v29 }
 0x827   : > { %1989 = vmatpush3.msra.mxu1 %v1223_v30  ;;  %1990 = vmatprep.mubr.msk.f32.mxu1 %vm2460_vm1, %v2459_v19 }
 0x828   : > { %1993 = vmatprep.subr.mxu1 %v2459_v19 }
 0x8f5   : > { %v2780_v31 = vpop.f32.mrb[12].mxu1 }
 0x8f6   : > { %v1982_v32 = vpop.f32.mrb[13].mxu1 }
 0x8f9   : > { %v1206_v33 = vpop.f32.mrb[14].mxu1 }
 0x8fa   : > { %v1987_v34 = vpop.f32.mrb[15].mxu1  ;;  %v1210_v35 = vsel %vm714_vm3, %v1206_v33, -inf }
 0x8fb   : > { %1211 = vmax.xlane.f32.xlu1 %v1210_v35 }
 0x90c   : > { %1461 = vrot.lane.b32.xlu1 %v561_v4, %s2461_s10 }
 0x988   : > { %v1212_v36 = vpop.xlane.xlu1 %1211 }
 0x989   : > { %v1213_v37 = vsub.f32 %v1206_v33, %v1212_v36 }
 0x98b   : > { %v1214_v38 = vmul.f32 1.442695, %v1213_v37 }
 0x98d   : > { %2282 = vpow2.f32 %v1214_v38 }
 0x997   : > { %v2283_v39 = vpop.eup %2282 }
 0x998   : > { %v1216_v40 = vsel %vm714_vm3, %v2283_v39, 0.0 }
 0x999   : > { %1217 = vadd.xlane.f32.xlu0 %v1216_v40 }
 0x9af   : > { %1298 = vrot.lane.b32.xlu0 %v561_v4, %s2462_s28  ;;  %v2128_v4 = vpack.c.bf16 %v341_v3, %v336_v2  ;;  %v1649_v2 = vld [vmem:[#allocation7 + $0x10] sm:$0xff]  ;;  %v1654_v3 = vld [vmem:[#allocation7 + $0x38] sm:$0xff] }
 0x9b1   : > { %2129 = vmatpush1.bf16.msra.mxu0 %v2128_v4  ;;  %v2147_v4 = vpack.c.bf16 %v1649_v2, %v1647_v0  ;;  %v1687_v2 = vld [vmem:[#allocation7 + $0x140] sm:$0xff] }
 0x9b2   : > { %2130 = vmatprep.subr.bf16.mxu0 %v2464_v49 }
 0x9b5   : > { %2132 = vmatpush1.bf16.msra.mxu0 %v2131_v8  ;;  %v1656_v8 = vld [vmem:[#allocation7 + $0x48] sm:$0xff] }
 0x9b6   : > { %2133 = vmatprep.subr.bf16.mxu0 %v2464_v49 }
 0x9b9   : > { %2135 = vmatpush1.bf16.msra.mxu0 %v2134_v12  ;;  %v2153_v12 = vpack.c.bf16 %v1658_v10, %v1656_v8  ;;  %v1693_v8 = vld [vmem:[#allocation7 + $0x170] sm:$0xff] }
 0x9ba   : > { %2136 = vmatprep.subr.bf16.mxu0 %v2464_v49  ;;  %v2191_v10 = vpack.c.bf16 %v1693_v8, %v1691_v7 }
 0x9bd   : > { %2138 = vmatpush1.bf16.msra.mxu0 %v2137_v15  ;;  %v1660_v15 = vld [vmem:[#allocation7 + $0x68] sm:$0xff] }
 0x9be   : > { %2139 = vmatprep.subr.bf16.mxu0 %v2464_v49 }
 0x9c1   : > { %2141 = vmatpush1.bf16.msra.mxu0 %v2140_v18  ;;  %v2157_v18 = vpack.c.bf16 %v1662_v16, %v1660_v15 }
 0x9c2   : > { %2142 = vmatprep.subr.bf16.mxu0 %v2464_v49 }
 0x9c5   : > { %2144 = vmatpush1.bf16.msra.mxu0 %v2143_v25  ;;  %v1664_v25 = vld [vmem:[#allocation7 + $0x88] sm:$0xff] }
 0x9c6   : > { %2146 = vmatprep.subr.bf16.mxu0 %v2145_v1  ;;  %v2185_v1 = vpack.c.bf16 %v1690_v63, %v1688_v62 }
 0x9c8   : > { %630 = vmatmul.mubr.f32.vlgmr.msra.gmra.mrb[2].mxu0 %v2685_v9  ;;  %v412_v9 = vsub.s32 4, %v2691_v21 }
 0x9c9   : > { %2148 = vmatpush1.bf16.msra.mxu0 %v2147_v4  ;;  %v1694_v4 = vld [vmem:[#allocation7 + $0x178] sm:$0xff] }
 0xa26   : > { %v1218_v41 = vpop.xlane.xlu0 %1217 }
 0xa27   : > { %2284 = vrcp.f32 %v1218_v41 }
 0xa2a   : > { %v1299_v45 = vpop.permute.xlu0 %1298 }
 0xa31   : > { %v2285_v42 = vpop.eup %2284 }
 0xa32   : > { %v1220_v43 = vmul.f32 0.07216878, %v2285_v42 }
 0xa34   : > { %v1221_v44 = vmul.f32 %v2283_v39, %v1220_v43  ;;  %v413_v39 = vrot.slane %v2699_v23, %v412_v9  ;;  %v1462_v43 = vpop.permute.xlu1 %1461  ;;  %v1669_v9 = vld [vmem:[#allocation7 + $0xb0] sm:$0xff] }
 0xa36   : > { %1991 = vmatmul.mubr.msk.f32.vlgmr.msra.gmra.mrb[16].mxu1 %vm714_vm3, %v1221_v44 }
 0xa37   : > { %1994 = vmatpush3.xpose.msk.msra.mxu1 %vm638_vm2, %v1299_v45  ;;  %1995 = vmatprep.mubr.msk.f32.mxu1 %vm2460_vm1, %v2459_v19 }
 0xa38   : > { %1998 = vmatprep.subr.mxu1 %v2459_v19 }
 0xa3a   : > { %1996 = vmatmul.mubr.msk.f32.vlgmr.msra.gmra.mrb[18].mxu1 %vm638_vm2, %v2704_v27 }
 0xa3b   : > { %2000 = vmatprep.mubr.msk.f32.mxu1 %vm2460_vm1, %v2459_v19 }
 0xa9b   : > { %v631_v40 = vpop.f32.mrb[2].mxu0 }
 0xa9c   : > { %v632_v41 = vadd.f32 %v631_v40, %v413_v39  ;;  %v633_v42 = vpop.f32.mrb[3].mxu0  ;;  %v1672_v39 = vld [vmem:[#allocation7 + $0xc8] sm:$0xff]  ;;  %v1674_v40 = vld [vmem:[#allocation7 + $0xd8] sm:$0xff] }
 0xa9d   : > { %v2169_v42 = vpack.c.bf16 %v1674_v40, %v1672_v39 }
 0xa9e   : > { %1999 = vmatpush3.msra.mxu1 %v632_v41 }
 0xa9f   : > { %2003 = vmatprep.subr.mxu1 %v2459_v19 }
 0xb09   : > { %v1294_v26 = vpop.f32.mrb[16].mxu1 }
 0xb0a   : > { %v1992_v29 = vpop.f32.mrb[17].mxu1 }
 0xb0b   : > { %v2159_v29 = vpack.c.bf16 %v1661_v24, %v1659_v20 }
 0xb0d   : > { %v1370_v30 = vpop.f32.mrb[18].mxu1 }
 0xb0e   : > { %v1997_v32 = vpop.f32.mrb[19].mxu1  ;;  %v1374_v33 = vsel %vm714_vm3, %v1370_v30, -inf }
 0xb0f   : > { %1375 = vmax.xlane.f32.xlu0 %v1374_v33  ;;  %v1663_v32 = vld [vmem:[#allocation7 + $0x80] sm:$0xff]  ;;  %v1665_v33 = vld [vmem:[#allocation7 + $0x90] sm:$0xff] }
 0xb9c   : > { %v1376_v34 = vpop.xlane.xlu0 %1375 }
 0xb9d   : > { %v1377_v35 = vsub.f32 %v1370_v30, %v1376_v34  ;;  %v1668_v34 = vld [vmem:[#allocation7 + $0xa8] sm:$0xff] }
 0xb9f   : > { %v1378_v36 = vmul.f32 1.442695, %v1377_v35  ;;  %v1670_v35 = vld [vmem:[#allocation7 + $0xb8] sm:$0xff] }
 0xba1   : > { %2286 = vpow2.f32 %v1378_v36  ;;  %v2163_v36 = vpack.c.bf16 %v1665_v33, %v1663_v32 }
 0xbab   : > { %v2287_v37 = vpop.eup %2286 }
 0xbac   : > { %v1380_v38 = vsel %vm714_vm3, %v2287_v37, 0.0 }
 0xbad   : > { %1381 = vadd.xlane.f32.xlu1 %v1380_v38  ;;  %v1667_v38 = vld [vmem:[#allocation7 + $0xa0] sm:$0xff] }
 0xbbe   : > { %1459 = vrot.lane.b32.xlu1 %v2704_v27, %s2463_s12 }
 0xc3a   : > { %v1382_v44 = vpop.xlane.xlu1 %1381 }
 0xc3b   : > { %2288 = vrcp.f32 %v1382_v44  ;;  %v1673_v44 = vld [vmem:[#allocation7 + $0xd0] sm:$0xff] }
 0xc3e   : > { %v1460_v23 = vpop.permute.xlu1 %1459 }
 0xc45   : > { %v2289_v45 = vpop.eup %2288 }
 0xc46   : > { %v1384_v46 = vmul.f32 0.07216878, %v2289_v45  ;;  %v1676_v45 = vld [vmem:[#allocation7 + $0xe8] sm:$0xff] }
 0xc48   : > { %v1385_v47 = vmul.f32 %v2287_v37, %v1384_v46  ;;  %v2165_v37 = vpack.c.bf16 %v1670_v35, %v1668_v34  ;;  %v1678_v46 = vld [vmem:[#allocation7 + $0xf8] sm:$0xff] }
 0xc4a   : > { %2001 = vmatmul.mubr.msk.f32.vlgmr.msra.gmra.mrb[20].mxu1 %vm714_vm3, %v1385_v47 }
 0xc4b   : > { %2004 = vmatpush3.xpose.msk.msra.mxu1 %vm638_vm2, %v1462_v43  ;;  %2005 = vmatprep.mubr.msk.f32.mxu1 %vm2460_vm1, %v2459_v19  ;;  %v1671_v43 = vld [vmem:[#allocation7 + $0xc0] sm:$0xff] }
 0xc4c   : > { %2008 = vmatprep.subr.mxu1 %v2459_v19  ;;  %v2171_v47 = vpack.c.bf16 %v1673_v44, %v1671_v43 }
 0xc4e   : > { %2006 = vmatmul.mubr.msk.f32.vlgmr.msra.gmra.mrb[22].mxu1 %vm638_vm2, %v1460_v23  ;;  %v2173_v23 = vpack.c.bf16 %v1678_v46, %v1676_v45 }
 0xc4f   : > { %2010 = vmatprep.mubr.msk.f32.mxu1 %vm2460_vm1, %v2459_v19 }
 0xd1d   : > { %v2811_v27 = vpop.f32.mrb[20].mxu1 }
 0xd1e   : > { %v2002_v48 = vpop.f32.mrb[21].mxu1 }
 0xd1f   : > { %v1675_v48 = vld [vmem:[#allocation7 + $0xe0] sm:$0xff] }
 0xd21   : > { %v1533_v49 = vpop.f32.mrb[22].mxu1 }
 0xd22   : > { %v2007_v50 = vpop.f32.mrb[23].mxu1  ;;  %v1537_v52 = vsel %vm714_vm3, %v1533_v49, -inf }
 0xd23   : > { %1538 = vmax.xlane.f32.xlu1 %v1537_v52  ;;  %v1680_v50 = vld [vmem:[#allocation7 + $0x108] sm:$0xff]  ;;  %v1682_v52 = vld [vmem:[#allocation7 + $0x118] sm:$0xff] }
 0xdb0   : > { %v1539_v53 = vpop.xlane.xlu1 %1538 }
 0xdb1   : > { %v1540_v54 = vsub.f32 %v1533_v49, %v1539_v53  ;;  %v1677_v49 = vld [vmem:[#allocation7 + $0xf0] sm:$0xff] }
 0xdb2   : > { %v2175_v53 = vpack.c.bf16 %v1677_v49, %v1675_v48 }
 0xdb3   : > { %v1541_v55 = vmul.f32 1.442695, %v1540_v54  ;;  %v2177_v54 = vpack.c.bf16 %v1682_v52, %v1680_v50 }
 0xdb5   : > { %2290 = vpow2.f32 %v1541_v55  ;;  %v1679_v55 = vld [vmem:[#allocation7 + $0x100] sm:$0xff] }
 0xdbf   : > { %v2291_v56 = vpop.eup %2290 }
 0xdc0   : > { %v1543_v57 = vsel %vm714_vm3, %v2291_v56, 0.0 }
 0xdc1   : > { %1544 = vadd.xlane.f32.xlu0 %v1543_v57  ;;  %v1684_v57 = vld [vmem:[#allocation7 + $0x128] sm:$0xff] }
 0xdd7   : > { %1550 = vrot.lane.b32.xlu0 %v632_v41, %s2463_s12  ;;  %v2167_v41 = vpack.c.bf16 %v1669_v9, %v1667_v38 }
 0xddb   : > { %1627 = vrot.lane.b32.xlu0 %v2759_v6, %s2461_s10  ;;  %v1652_v6 = vld [vmem:[#allocation7 + $0x28] sm:$0xff] }
 0xddf   : > { %1631 = vrot.lane.b32.xlu0 %v2780_v31, %s2462_s28  ;;  %v2149_v31 = vpack.c.bf16 %v1654_v3, %v1652_v6  ;;  %v1689_v6 = vld [vmem:[#allocation7 + $0x150] sm:$0xff]  ;;  %v1692_v3 = vld [vmem:[#allocation7 + $0x168] sm:$0xff] }
 0xde0   : > { %v2189_v5 = vpack.c.bf16 %v1694_v4, %v1692_v3 }
 0xde1   : > { %2150 = vmatprep.subr.bf16.mxu0 %v2149_v31  ;;  %v2187_v31 = vpack.c.bf16 %v1689_v6, %v1687_v2 }
 0xde2   : > { %2152 = vmatpush1.bf16.msra.mxu0 %v2151_v11 }
 0xde3   : > { %1635 = vrot.lane.b32.xlu0 %v1294_v26, %s2463_s12  ;;  %2154 = vmatprep.subr.bf16.mxu0 %v2153_v12  ;;  %v1666_v26 = vld [vmem:[#allocation7 + $0x98] sm:$0xff] }
 0xde4   : > { %v2161_v30 = vpack.c.bf16 %v1666_v26, %v1664_v25  ;;  %v1695_v25 = vld [vmem:[%s2891_s4] sm:$0x3] }
 0xde5   : > { %v1700_v26 = vrot.slane %v1695_v25, %v396_v28 }
 0xde6   : > { %2156 = vmatpush1.bf16.msra.mxu0 %v2155_v17 }
 0xde7   : > { %2158 = vmatprep.subr.bf16.mxu0 %v2157_v18 }
 0xdea   : > { %2160 = vmatpush1.bf16.msra.mxu0 %v2159_v29 }
 0xdeb   : > { %2162 = vmatprep.subr.bf16.mxu0 %v2161_v30 }
 0xdee   : > { %2164 = vmatpush1.bf16.msra.mxu0 %v2163_v36 }
 0xdef   : > { %2166 = vmatprep.subr.bf16.mxu0 %v2165_v37 }
 0xdf2   : > { %2168 = vmatpush1.bf16.msra.mxu0 %v2167_v41 }
 0xdf3   : > { %2170 = vmatprep.subr.bf16.mxu0 %v2169_v42 }
 0xdf6   : > { %2172 = vmatpush1.bf16.msra.mxu0 %v2171_v47 }
 0xdf7   : > { %2174 = vmatprep.subr.bf16.mxu0 %v2173_v23 }
 0xdfa   : > { %2176 = vmatpush1.bf16.msra.mxu0 %v2175_v53 }
 0xdfb   : > { %2178 = vmatprep.subr.bf16.mxu0 %v2177_v54 }
 0xe4e   : > { %v1545_v19 = vpop.xlane.xlu0 %1544 }
 0xe4f   : > { %2292 = vrcp.f32 %v1545_v19  ;;  %v1686_v19 = vld [vmem:[#allocation7 + $0x138] sm:$0xff] }
 0xe52   : > { %v1551_v58 = vpop.permute.xlu0 %1550 }
 0xe53   : > { %2009 = vmatpush3.msra.mxu1 %v1551_v58 }
 0xe56   : > { %v1628_v13 = vpop.permute.xlu0 %1627 }
 0xe57   : > { %v1642_v16 = vsel %vm638_vm2, %v2740_v51, %v1628_v13  ;;  %v1704_v51 = vrot.slane %v1695_v25, %v400_v22 }
 0xe59   : > { %v2293_v59 = vpop.eup %2292 }
 0xe5a   : > { %v1547_v60 = vmul.f32 0.07216878, %v2293_v59  ;;  %v2181_v59 = vpack.c.bf16 %v1686_v19, %v1684_v57  ;;  %v1632_v14 = vpop.permute.xlu0 %1631 }
 0xe5b   : > { %v1643_v18 = vsel %vm419_vm0, %v1642_v16, %v1632_v14 }
 0xe5c   : > { %v1548_v61 = vmul.f32 %v2291_v56, %v1547_v60  ;;  %v1681_v56 = vld [vmem:[#allocation7 + $0x110] sm:$0xff]  ;;  %v1683_v60 = vld [vmem:[#allocation7 + $0x120] sm:$0xff] }
 0xe5d   : > { %v2179_v58 = vpack.c.bf16 %v1681_v56, %v1679_v55 }
 0xe5e   : > { %2011 = vmatmul.mubr.msk.f32.vlgmr.msra.gmra.mrb[24].mxu1 %vm714_vm3, %v1548_v61  ;;  %v1685_v61 = vld [vmem:[#allocation7 + $0x130] sm:$0xff]  ;;  %v1636_v15 = vpop.permute.xlu0 %1635 }
 0xe5f   : > { %2180 = vmatpush1.bf16.msra.mxu0 %v2179_v58  ;;  %v2183_v0 = vpack.c.bf16 %v1685_v61, %v1683_v60  ;;  %v1645_v24 = vsel %vm1644_vm4, %v1643_v18, %v1636_v15 }
 0xe60   : > { %2182 = vmatprep.subr.bf16.mxu0 %v2181_v59 }
 0xe63   : > { %2184 = vmatpush1.bf16.msra.mxu0 %v2183_v0 }
 0xe64   : > { %2186 = vmatprep.subr.bf16.mxu0 %v2185_v1 }
 0xe67   : > { %2188 = vmatpush1.bf16.msra.mxu0 %v2187_v31 }
 0xe68   : > { %2190 = vmatprep.subr.bf16.mxu0 %v2189_v5 }
 0xe6b   : > { %2192 = vmatpush1.bf16.msra.mxu0 %v2191_v10 }
 0xf31   : > { %v1622_v11 = vpop.f32.mrb[24].mxu1 }
 0xf32   : > { %1639 = vrot.lane.b32.xlu1 %v1622_v11, %s2461_s10  ;;  %v2012_v12 = vpop.f32.mrb[25].mxu1 }
 0xfa4   : > { %v1640_v17 = vpop.permute.xlu1 %1639 }
 0xfa5   : > { %v1646_v20 = vsel %vm638_vm2, %v2811_v27, %v1640_v17 }
 0xfa6   : > { %1921 = vmatprep.mubr.msk.f32.mxu0 %vm419_vm0, %v1646_v20 }
 0xfa7   : > { %1775 = vmatmul.mubr.f32.vlgmr.msra.gmra.mrb[4].mxu0 %v1645_v24 }
0x107a   : > { %v1776_v27 = vpop.f32.mrb[4].mxu0 }
0x107b   : > { %v1777_v29 = vadd.f32 %v1776_v27, %v1700_v26  ;;  %v1778_v30 = vpop.f32.mrb[5].mxu0 }
0x107c   : > { %v1779_v32 = vadd.f32 %v1778_v30, %v1704_v51 }
0x107d   : > { %1781 = vst [vmem:[%s269_s29] sm:$0xff] %v1777_v29 }
0x107e   : > { %1782 = vst.msk [vmem:[%s269_s29 + $0x8] sm:$0xff] %vm419_vm0, %v1779_v32 }
0x107f   : > { %2393 = shalt.err (!%p2390_p2)
}
0x1080   : > { %s2394_s14 = scalar_lea.hbm %s2842_s17, 256  ;;  %s2398_s12 = scalar_lea.hbm %s2892_s5, 512 }
0x1081   : > { %p2395_p13 = scmp.ne.s32.totalorder %s2842_s17, %s2394_s14  ;;  %p2399_p4 = scmp.lt.u32.totalorder %s2842_s17, %s2892_s5 }
0x1082   : > { %p2400_p7 = scmp.lt.u32.totalorder %s2398_s12, %s2394_s14  ;;  %p2402_p11 = scmp.lt.u32.totalorder %s2394_s14, %s2842_s17 }
0x1083   : > { %p2396_p6 = pnand %p2395_p13, %p2906_p0 }
0x1084   : > { %p2401_p8 = por %p2400_p7, %p2399_p4 }
0x1085   : > { %p2397_p10 = pneg %p2396_p6 }
0x1086   : > { %p2403_p1 = por %p2402_p11, %p2401_p8 }
0x1088   : > { %p2404_p3 = pnand %p2403_p1, %p2397_p10 }
0x108a   : > { %2407 = shalt.err (!%p2404_p3)
}
0x108b   : > { %2203 = dma.vmem_to_hbm [thread:$0]  (%p2906_p0), %s2844_s8, 256, %s2842_s17, %s1784_s22  }
0x108c PF: > { %s1810_s6 = sand.u32 1, %s2438_s18   ;;  %p2907_p5 = scmp.ne.s32.totalorder %s2897_s25, 0 }
0x108d   : > { %p2908_p9 = scmp.ge.s32.totalorder %s2450_s21, 2  ;;  %s1811_s29 = scalar_lea.sflag [#allocation4], %s1810_s6 }
0x108f   : > { %p2217_p12 = pnand %p2908_p9, %p2907_p5 }
0x1091   : > { %2433 = dma.done.wait (!%p2217_p12), %s1811_s29, 256  }
0x1092   : > { %2435 = vsyncadd (!%p2217_p12), %s1811_s29, 4294967040  ;;  %p19_p2 = scmp.ge.s32.totalorder %s2606_s16, 4   ;;  %s2909_s18 = smov %s2442_s19 }
0x1093   : > { %s2910_s19 = smov %s2446_s20  ;;  %s2911_s20 = smov %s2615_s27 }
0x1094   : > { %s2912_s21 = smov %s2606_s16  ;;  %21 = sbr.rel (!%p19_p2) target bundleno = 6 (0x6), region = 93 }
0x109b   :  { %1816 = vsyncpa [#allocation3], 1 }
0x109c   :  { %1818 = vsyncpa [#allocation3 + $0x1], 1 }
0x109d   :  { %1819 = vsyncpa [#allocation6], 1 }
0x109e   :  { %1820 = vsyncpa [#allocation4], 1 }
0x109f   :  { %1822 = vsyncpa [#allocation4 + $0x1], 1 }

</bundles_post_ra>
